<compile_context>
chip_gen: v7x
topology: tpu7x:2x2x1
jax: 0.10.0
libtpu: 0.0.40
codegen_flags: <defaults>
</compile_context>

<pallas_src>
import functools

import jax
import jax.numpy as jnp
from jax.experimental import pallas as pl
from jax.experimental.pallas import tpu as pltpu

BN_EPS = 1e-5  # nn.BatchNorm1d default


def _seg_head_kernel(x_ref, w1_ref, b1_ref, w2_ref, b2_ref, o_ref):
    # Linear1 (eval-BN already folded into w1/b1) + ReLU.
    h = jnp.dot(x_ref[...], w1_ref[...], preferred_element_type=jnp.float32)
    h = jnp.maximum(h + b1_ref[...], 0.0)
    # TODO(synk): training-mode dropout (stochastic mask via pltpu.prng_*) not emitted;
    # eval mode => identity.
    # Linear2.
    logits = jnp.dot(h, w2_ref[...], preferred_element_type=jnp.float32)
    o_ref[...] = (logits + b2_ref[...]).astype(o_ref.dtype)


def _round_up(a, m):
    return ((a + m - 1) // m) * m


@functools.partial(jax.jit, static_argnames=("tile_n",))
def variable_seg_head(x, params, *, tile_n=1024):
    """x: (N, C_in); params: dict of head weights.  Returns (N, num_classes)."""
    N, c_in = x.shape
    w1, b1 = params["w1"], params["b1"]            # (C_mid, C_in), (1, C_mid)
    gamma, beta = params["gamma"], params["beta"]  # (1, C_mid)
    mean, var = params["mean"], params["var"]      # (1, C_mid)
    w2, b2 = params["w2"], params["b2"]            # (num_classes, C_mid), (1, num_classes)
    c_mid = w1.shape[0]
    num_classes = w2.shape[0]

    # ---- Fold eval-mode BatchNorm into Linear1, pre-transpose both weights (once) ----
    scale = gamma * jax.lax.rsqrt(var + BN_EPS)    # (1, C_mid)
    w1t = w1.T * scale                             # (C_in, C_mid)  == (W1^T) * scale
    b1f = (b1 - mean) * scale + beta               # (1, C_mid)
    w2t = w2.T                                     # (C_mid, num_classes)

    # ---- Tile selection: big tiles, but keep >= 2 grid steps when N allows ----
    tile = max(8, min(tile_n, _round_up(pl.cdiv(N, 2), 8)))
    n_padded = _round_up(N, tile)
    if n_padded != N:                              # ragged point count: pad, slice back
        x = jnp.pad(x, ((0, n_padded - N), (0, 0)))
    grid = (n_padded // tile,)

    full = lambda i: (0, 0)  # whole-array (replicated) blocks; block index is constant

    out = pl.pallas_call(
        _seg_head_kernel,
        out_shape=jax.ShapeDtypeStruct((n_padded, num_classes), x.dtype),
        grid_spec=pltpu.PrefetchScalarGridSpec(
            num_scalar_prefetch=0,
            grid=grid,
            in_specs=[
                pl.BlockSpec((tile, c_in), lambda i: (i, 0)),  # x tile
                pl.BlockSpec((c_in, c_mid), full),             # folded W1^T
                pl.BlockSpec((1, c_mid), full),                # folded b1
                pl.BlockSpec((c_mid, num_classes), full),      # W2^T
                pl.BlockSpec((1, num_classes), full),          # b2
            ],
            out_specs=pl.BlockSpec((tile, num_classes), lambda i: (i, 0)),
        ),
        compiler_params=pltpu.CompilerParams(
            dimension_semantics=("parallel",)),
    )(x, w1t, b1f, w2t, b2)
    return out[:N]


def _reference(x, p):
    h = x @ p["w1"].T + p["b1"]
    h = (h - p["mean"]) / jnp.sqrt(p["var"] + BN_EPS) * p["gamma"] + p["beta"]
    h = jnp.maximum(h, 0.0)
    return h @ p["w2"].T + p["b2"]


def _init_params(key, in_channels, num_classes):
    ks = jax.random.split(key, 8)
    c = in_channels
    return {
        "w1": jax.random.normal(ks[0], (c, c), jnp.float32) * 0.1,
        "b1": jax.random.normal(ks[1], (1, c), jnp.float32) * 0.05,
        "gamma": 1.0 + 0.1 * jax.random.normal(ks[2], (1, c), jnp.float32),
        "beta": 0.05 * jax.random.normal(ks[3], (1, c), jnp.float32),
        "mean": 0.1 * jax.random.normal(ks[4], (1, c), jnp.float32),
        "var": jnp.abs(1.0 + 0.1 * jax.random.normal(ks[5], (1, c), jnp.float32)),
        "w2": jax.random.normal(ks[6], (num_classes, c), jnp.float32) * 0.1,
        "b2": jax.random.normal(ks[7], (1, num_classes), jnp.float32) * 0.05,
    }


if __name__ == "__main__":
    key = jax.random.PRNGKey(0)
    kx, kp = jax.random.split(key)

    N = 1000          # deliberately NOT a multiple of the tile: exercises ragged path
    in_channels = 32
    num_classes = 13

    x = jax.random.normal(kx, (N, in_channels), jnp.float32)
    params = _init_params(kp, in_channels, num_classes)

    logits = variable_seg_head(x, params, tile_n=1024)
    logits = jax.block_until_ready(logits)

    ref = _reference(x, params)
    assert logits.shape == (N, num_classes)
    assert jnp.allclose(logits, ref, atol=1e-3, rtol=1e-3), "mismatch vs JAX reference"

    print("KERNEL_OK")
</pallas_src>

<mosaic_0001>
module attributes {stable_mosaic.version = 11 : i64} {
  func.func @_seg_head_kernel(%arg0: i32, %arg1: memref<504x32xf32, #tpu.memory_space<vmem>>, %arg2: memref<32x32xf32, #tpu.memory_space<vmem>>, %arg3: memref<1x32xf32, #tpu.memory_space<vmem>>, %arg4: memref<32x13xf32, #tpu.memory_space<vmem>>, %arg5: memref<1x13xf32, #tpu.memory_space<vmem>>, %arg6: memref<504x13xf32, #tpu.memory_space<vmem>>) attributes {dimension_semantics = [#tpu.dimension_semantics<parallel>], iteration_bounds = array<i64: 2>, scalar_prefetch = 0 : i64, scratch_operands = 0 : i64, tpu.core_type = #tpu.core_type<tc>, window_params = [{transform_indices = @transform_0, window_bounds = array<i64: 504, 32>}, {pipeline_mode = #tpu.pipeline_mode<synchronous>, transform_indices = @transform_1, window_bounds = array<i64: 32, 32>}, {pipeline_mode = #tpu.pipeline_mode<synchronous>, transform_indices = @transform_2, window_bounds = array<i64: 1, 32>}, {pipeline_mode = #tpu.pipeline_mode<synchronous>, transform_indices = @transform_3, window_bounds = array<i64: 32, 13>}, {pipeline_mode = #tpu.pipeline_mode<synchronous>, transform_indices = @transform_4, window_bounds = array<i64: 1, 13>}, {transform_indices = @transform_5, window_bounds = array<i64: 504, 13>}]} {
    %c0 = arith.constant 0 : index
    %c0_0 = arith.constant 0 : index
    %0 = vector.load %arg1[%c0, %c0_0] : memref<504x32xf32, #tpu.memory_space<vmem>>, vector<504x32xf32>
    %c0_1 = arith.constant 0 : index
    %c0_2 = arith.constant 0 : index
    %1 = vector.load %arg2[%c0_1, %c0_2] : memref<32x32xf32, #tpu.memory_space<vmem>>, vector<32x32xf32>
    %cst = arith.constant dense<0.000000e+00> : vector<504x32xf32>
    %2 = tpu.matmul %0, %1, %cst {dimension_numbers = #tpu.dot_dimension_numbers<[1], [0], [0], [1], [0, 0, 1, 1], [], []>} : vector<504x32xf32>, vector<32x32xf32>, vector<504x32xf32> -> vector<504x32xf32>
    %c0_3 = arith.constant 0 : index
    %c0_4 = arith.constant 0 : index
    %3 = vector.load %arg3[%c0_3, %c0_4] : memref<1x32xf32, #tpu.memory_space<vmem>>, vector<1x32xf32>
    %4 = vector.broadcast %3 : vector<1x32xf32> to vector<504x32xf32>
    %5 = arith.addf %2, %4 : vector<504x32xf32>
    %cst_5 = arith.constant 0.000000e+00 : f32
    %6 = vector.broadcast %cst_5 : f32 to vector<504x32xf32>
    %7 = arith.maximumf %5, %6 : vector<504x32xf32>
    %c0_6 = arith.constant 0 : index
    %c0_7 = arith.constant 0 : index
    %8 = vector.load %arg4[%c0_6, %c0_7] : memref<32x13xf32, #tpu.memory_space<vmem>>, vector<32x13xf32>
    %cst_8 = arith.constant dense<0.000000e+00> : vector<504x13xf32>
    %9 = tpu.matmul %7, %8, %cst_8 {dimension_numbers = #tpu.dot_dimension_numbers<[1], [0], [0], [1], [0, 0, 1, 1], [], []>} : vector<504x32xf32>, vector<32x13xf32>, vector<504x13xf32> -> vector<504x13xf32>
    %c0_9 = arith.constant 0 : index
    %c0_10 = arith.constant 0 : index
    %10 = vector.load %arg5[%c0_9, %c0_10] : memref<1x13xf32, #tpu.memory_space<vmem>>, vector<1x13xf32>
    %11 = vector.broadcast %10 : vector<1x13xf32> to vector<504x13xf32>
    %12 = arith.addf %9, %11 : vector<504x13xf32>
    %c0_11 = arith.constant 0 : index
    %c0_12 = arith.constant 0 : index
    %13 = vector.load %arg6[%c0_11, %c0_12] : memref<504x13xf32, #tpu.memory_space<vmem>>, vector<504x13xf32>
    tpu.vector_store %arg6[%c0_11, %c0_12], %12 {strides = array<i32>} : memref<504x13xf32, #tpu.memory_space<vmem>>, vector<504x13xf32>,
    return
  }
  func.func @transform_0(%arg0: i32) -> (i32, i32) {
    %c0_i32 = arith.constant 0 : i32
    %c0_i32_0 = arith.constant 0 : i32
    return %arg0, %c0_i32 : i32, i32
  }
  func.func @transform_1(%arg0: i32) -> (i32, i32) {
    %c0_i32 = arith.constant 0 : i32
    %c0_i32_0 = arith.constant 0 : i32
    %c0_i32_1 = arith.constant 0 : i32
    return %c0_i32, %c0_i32_0 : i32, i32
  }
  func.func @transform_2(%arg0: i32) -> (i32, i32) {
    %c0_i32 = arith.constant 0 : i32
    %c0_i32_0 = arith.constant 0 : i32
    %c0_i32_1 = arith.constant 0 : i32
    return %c0_i32, %c0_i32_0 : i32, i32
  }
  func.func @transform_3(%arg0: i32) -> (i32, i32) {
    %c0_i32 = arith.constant 0 : i32
    %c0_i32_0 = arith.constant 0 : i32
    %c0_i32_1 = arith.constant 0 : i32
    return %c0_i32, %c0_i32_0 : i32, i32
  }
  func.func @transform_4(%arg0: i32) -> (i32, i32) {
    %c0_i32 = arith.constant 0 : i32
    %c0_i32_0 = arith.constant 0 : i32
    %c0_i32_1 = arith.constant 0 : i32
    return %c0_i32, %c0_i32_0 : i32, i32
  }
  func.func @transform_5(%arg0: i32) -> (i32, i32) {
    %c0_i32 = arith.constant 0 : i32
    %c0_i32_0 = arith.constant 0 : i32
    return %arg0, %c0_i32 : i32, i32
  }
}

</mosaic_0001>

<bundles_post_ra>
// kernel: variable_seg_head.1
= control target key start
LH: loop header
LB: loop body
LE: loop exit
PB: predicated region body
PF: predicated region fallthrough
CT: control target
= control target key end

     0   :  { %s2364_s18 = smov 0   ;;  %s3123_s0 = inlined_call_operand.vmem [shape: f32[1008,32], index: 0, kind: input, shape index: {}]   ;;  %s3124_s1 = inlined_call_operand.vmem [shape: f32[32,32], index: 1, kind: input, shape index: {}]   ;;  %s3125_s2 = inlined_call_operand.vmem [shape: f32[1,32], index: 2, kind: input, shape index: {}]   ;;  %s3126_s3 = inlined_call_operand.vmem [shape: f32[32,13], index: 3, kind: input, shape index: {}]   ;;  %s3127_s4 = inlined_call_operand.vmem [shape: f32[1,13], index: 4, kind: input, shape index: {}]   ;;  %s3128_s5 = inlined_call_operand.vmem [shape: f32[1008,13], index: 5, kind: output, shape index: {}]  }
   0x1 LB: > { %s1635_s19 = sadd.s32 4294967295, %s2329_s18   ;;  %p1639_p0 = scmp.ge.s32.totalorder %s2329_s18, 1  ;;  %s2329_s18 = sphi %s2364_s18, %s15_s18  }
   0x2   : > { %p188_p1 = scmp.lt.s32.totalorder %s2329_s18, 3 }
   0x4   : > { %p189_p2 = pnand %p1639_p0, %p188_p1 }
   0x5   : > { %v291_v0 = vld [vmem:[%s3124_s1] sm:$0xff] (!%p189_p2)  ;;  %v292_v1 = vld [vmem:[%s3124_s1 + $0x8] sm:$0xff] (!%p189_p2)  ;;  %v293_v2 = vld [vmem:[%s3124_s1 + $0x10] sm:$0xff] (!%p189_p2)  ;;  %v2331_v3 = vmov (!%p189_p2), 0.0|0.0   ;;  %vm2332_vm0 = vmmov (!%p189_p2), 0   ;;  %v2333_v6 = vmov (!%p189_p2), 0.0  }
   0x6   : > { %192 = sbr.rel (%p189_p2) target bundleno = 696 (0x2b8), region = 40  ;;  %2300 = vmatprep.subr.bf16.mxu0 (!%p189_p2), %v2331_v3  ;;  %v2301_v4 = vpack.c.bf16 (!%p189_p2), %v292_v1, %v291_v0  ;;  %v294_v5 = vld [vmem:[%s3124_s1 + $0x18] sm:$0xff] (!%p189_p2)  ;;  %1914 = vmatprep.mubr.msk.f32.mxu0 (!%p189_p2), %vm2332_vm0, %v2333_v6  ;;  %vm302_vm1 = vcmask (!%p189_p2), 261120   ;;  %v935_v29 = vld [vmem:[%s3126_s3] sm:$0xff] (!%p189_p2)  ;;  %v936_v30 = vld [vmem:[%s3126_s3 + $0x8] sm:$0xff] (!%p189_p2)  ;;  %vm1515_vm2 = vcmask (!%p189_p2), 105472  }
   0x7   : > { %s216_s28 = smul.u32 (!%p189_p2), 63, %s1635_s19  ;;  %2306 = vmatprep.subr.bf16.mxu1 (!%p189_p2), %v2331_v3  ;;  %2111 = vmatprep.mubr.msk.f32.mxu1 (!%p189_p2), %vm2332_vm0, %v2333_v6  ;;  %v2304_v7 = vpack.c.bf16 (!%p189_p2), %v294_v5, %v293_v2  ;;  %v2307_v31 = vpack.c.bf16 (!%p189_p2), %v936_v30, %v935_v29  ;;  %v937_v33 = vld [vmem:[%s3126_s3 + $0x10] sm:$0xff] (!%p189_p2)  ;;  %v938_v34 = vld [vmem:[%s3126_s3 + $0x18] sm:$0xff] (!%p189_p2) }
   0x8   : > { %2302 = vmatpush3.bf16.msra.mxu0 (!%p189_p2), %v2301_v4  ;;  %v2310_v35 = vpack.c.bf16 (!%p189_p2), %v938_v34, %v937_v33 }
   0x9   : > { %p217_p3 = scmp.lt.s32.totalorder (!%p189_p2), %s216_s28, 125  ;;  %2303 = vmatprep.subr.bf16.mxu0 (!%p189_p2), %v2331_v3  ;;  %2308 = vmatpush3.bf16.msra.mxu1 (!%p189_p2), %v2307_v31 }
   0xa   : > { %2309 = vmatprep.subr.bf16.mxu1 (!%p189_p2), %v2331_v3  ;;  %v2627_v3 = vld [vmem:[%s3125_s2] ss:$0 sm:$0xff] (!%p189_p2) }
   0xc   : > { %2305 = vmatpush3.bf16.msra.mxu0 (!%p189_p2), %v2304_v7 }
   0xd   : > { %s3130_s28 = smov (!%p217_p3, %s216_s28), 125  ;;  %2311 = vmatpush3.bf16.msra.mxu1 %v2310_v35 }
   0xe   : > { %s1640_s29 = sshll.u32 %s3130_s28, 3 }
   0xf   : > { %s2399_s7 = scalar_lea.vmem %s3123_s0, %s1640_s29  ;;  %s2892_s23 = scalar_lea.vmem %s3128_s5, %s1640_s29 }
  0x10   : > { %v228_v8 = vld [vmem:[%s2399_s7] sm:$0xff]  ;;  %v229_v9 = vld [vmem:[%s2399_s7 + $0x8] sm:$0xff]  ;;  %v230_v10 = vld [vmem:[%s2399_s7 + $0x10] sm:$0xff] }
  0x11   : > { %1915 = vmatmul.mubr.msk.f32.vlgmr.msra.gmra.mrb[0].mxu0 %vm302_vm1, %v228_v8  ;;  %v231_v11 = vld [vmem:[%s2399_s7 + $0x18] sm:$0xff]  ;;  %v232_v12 = vld [vmem:[%s2399_s7 + $0x20] sm:$0xff]  ;;  %v233_v13 = vld [vmem:[%s2399_s7 + $0x28] sm:$0xff] }
  0x12   : > { %1917 = vmatprep.mubr.msk.f32.mxu0 %vm2332_vm0, %v2333_v6  ;;  %v234_v14 = vld [vmem:[%s2399_s7 + $0x30] sm:$0xff]  ;;  %v235_v15 = vld [vmem:[%s2399_s7 + $0x38] sm:$0xff]  ;;  %v236_v16 = vld [vmem:[%s2399_s7 + $0x40] sm:$0xff] }
  0x13   : > { %v237_v17 = vld [vmem:[%s2399_s7 + $0x48] sm:$0xff]  ;;  %v238_v18 = vld [vmem:[%s2399_s7 + $0x50] sm:$0xff]  ;;  %v239_v19 = vld [vmem:[%s2399_s7 + $0x58] sm:$0xff] }
  0x14   : > { %v240_v20 = vld [vmem:[%s2399_s7 + $0x60] sm:$0xff]  ;;  %v241_v21 = vld [vmem:[%s2399_s7 + $0x68] sm:$0xff]  ;;  %v242_v22 = vld [vmem:[%s2399_s7 + $0x70] sm:$0xff] }
  0x15   : > { %1918 = vmatmul.mubr.msk.f32.gmra.mrb[2].mxu0 %vm302_vm1, %v229_v9  ;;  %v243_v23 = vld [vmem:[%s2399_s7 + $0x78] sm:$0xff]  ;;  %v244_v24 = vld [vmem:[%s2399_s7 + $0x80] sm:$0xff]  ;;  %v245_v25 = vld [vmem:[%s2399_s7 + $0x88] sm:$0xff] }
  0x16   : > { %1920 = vmatprep.mubr.msk.f32.mxu0 %vm2332_vm0, %v2333_v6  ;;  %v246_v26 = vld [vmem:[%s2399_s7 + $0x90] sm:$0xff]  ;;  %v247_v27 = vld [vmem:[%s2399_s7 + $0x98] sm:$0xff]  ;;  %v248_v28 = vld [vmem:[%s2399_s7 + $0xa0] sm:$0xff] }
  0x17   : > { %v249_v32 = vld [vmem:[%s2399_s7 + $0xa8] sm:$0xff]  ;;  %v250_v36 = vld [vmem:[%s2399_s7 + $0xb0] sm:$0xff]  ;;  %v251_v37 = vld [vmem:[%s2399_s7 + $0xb8] sm:$0xff] }
  0x18   : > { %v252_v38 = vld [vmem:[%s2399_s7 + $0xc0] sm:$0xff]  ;;  %v253_v39 = vld [vmem:[%s2399_s7 + $0xc8] sm:$0xff]  ;;  %v254_v40 = vld [vmem:[%s2399_s7 + $0xd0] sm:$0xff] }
  0x19   : > { %1921 = vmatmul.mubr.msk.f32.gmra.mrb[4].mxu0 %vm302_vm1, %v230_v10  ;;  %v255_v41 = vld [vmem:[%s2399_s7 + $0xd8] sm:$0xff]  ;;  %v256_v42 = vld [vmem:[%s2399_s7 + $0xe0] sm:$0xff]  ;;  %v257_v43 = vld [vmem:[%s2399_s7 + $0xe8] sm:$0xff] }
  0x1a   : > { %1923 = vmatprep.mubr.msk.f32.mxu0 %vm2332_vm0, %v2333_v6  ;;  %v258_v44 = vld [vmem:[%s2399_s7 + $0xf0] sm:$0xff]  ;;  %v259_v45 = vld [vmem:[%s2399_s7 + $0xf8] sm:$0xff]  ;;  %v260_v46 = vld [vmem:[%s2399_s7 + $0x100] sm:$0xff] }
  0x1b   : > { %v261_v47 = vld [vmem:[%s2399_s7 + $0x108] sm:$0xff]  ;;  %v262_v48 = vld [vmem:[%s2399_s7 + $0x110] sm:$0xff]  ;;  %v263_v49 = vld [vmem:[%s2399_s7 + $0x118] sm:$0xff] }
  0x1c   : > { %v264_v50 = vld [vmem:[%s2399_s7 + $0x120] sm:$0xff]  ;;  %v265_v51 = vld [vmem:[%s2399_s7 + $0x128] sm:$0xff]  ;;  %v266_v52 = vld [vmem:[%s2399_s7 + $0x130] sm:$0xff] }
  0x1d   : > { %1924 = vmatmul.mubr.msk.f32.gmra.mrb[6].mxu0 %vm302_vm1, %v231_v11  ;;  %v267_v53 = vld [vmem:[%s2399_s7 + $0x138] sm:$0xff]  ;;  %v268_v54 = vld [vmem:[%s2399_s7 + $0x140] sm:$0xff]  ;;  %v269_v55 = vld [vmem:[%s2399_s7 + $0x148] sm:$0xff] }
  0x1e   : > { %1926 = vmatprep.mubr.msk.f32.mxu0 %vm2332_vm0, %v2333_v6  ;;  %v270_v56 = vld [vmem:[%s2399_s7 + $0x150] sm:$0xff]  ;;  %v271_v57 = vld [vmem:[%s2399_s7 + $0x158] sm:$0xff]  ;;  %v272_v58 = vld [vmem:[%s2399_s7 + $0x160] sm:$0xff] }
  0x1f   : > { %v273_v59 = vld [vmem:[%s2399_s7 + $0x168] sm:$0xff]  ;;  %v274_v60 = vld [vmem:[%s2399_s7 + $0x170] sm:$0xff]  ;;  %v275_v61 = vld [vmem:[%s2399_s7 + $0x178] sm:$0xff] }
  0x20   : > { %v276_v62 = vld [vmem:[%s2399_s7 + $0x180] sm:$0xff]  ;;  %v277_v63 = vld [vmem:[%s2399_s7 + $0x188] sm:$0xff]  ;;  %v278_v0 = vld [vmem:[%s2399_s7 + $0x190] sm:$0xff] }
  0x21   : > { %1927 = vmatmul.mubr.msk.f32.gmra.mrb[8].mxu0 %vm302_vm1, %v232_v12  ;;  %v279_v1 = vld [vmem:[%s2399_s7 + $0x198] sm:$0xff]  ;;  %v280_v2 = vld [vmem:[%s2399_s7 + $0x1a0] sm:$0xff]  ;;  %v281_v4 = vld [vmem:[%s2399_s7 + $0x1a8] sm:$0xff] }
  0x22   : > { %1929 = vmatprep.mubr.msk.f32.mxu0 %vm2332_vm0, %v2333_v6  ;;  %v282_v9 = vld [vmem:[%s2399_s7 + $0x1b0] sm:$0xff]  ;;  %v287_v34 = vld [vmem:[%s2399_s7 + $0x1d8] sm:$0xff] }
  0x23   : > { %v286_v29 = vld [vmem:[%s2399_s7 + $0x1d0] sm:$0xff] }
  0x25   : > { %1930 = vmatmul.mubr.msk.f32.gmra.mrb[10].mxu0 %vm302_vm1, %v233_v13 }
  0x26   : > { %1932 = vmatprep.mubr.msk.f32.mxu0 %vm2332_vm0, %v2333_v6 }
  0x29   : > { %1933 = vmatmul.mubr.msk.f32.gmra.mrb[12].mxu0 %vm302_vm1, %v234_v14  ;;  %v283_v14 = vld [vmem:[%s2399_s7 + $0x1b8] sm:$0xff] }
  0x2a   : > { %1935 = vmatprep.mubr.msk.f32.mxu0 %vm2332_vm0, %v2333_v6 }
  0x2d   : > { %1936 = vmatmul.mubr.msk.f32.gmra.mrb[14].mxu0 %vm302_vm1, %v235_v15 }
  0x2e   : > { %1938 = vmatprep.mubr.msk.f32.mxu0 %vm2332_vm0, %v2333_v6 }
  0x31   : > { %1939 = vmatmul.mubr.msk.f32.gmra.mrb[16].mxu0 %vm302_vm1, %v236_v16 }
  0x32   : > { %1941 = vmatprep.mubr.msk.f32.mxu0 %vm2332_vm0, %v2333_v6 }
  0x35   : > { %1942 = vmatmul.mubr.msk.f32.gmra.mrb[18].mxu0 %vm302_vm1, %v237_v17 }
  0x36   : > { %1944 = vmatprep.mubr.msk.f32.mxu0 %vm2332_vm0, %v2333_v6 }
  0x39   : > { %1945 = vmatmul.mubr.msk.f32.gmra.mrb[20].mxu0 %vm302_vm1, %v238_v18 }
  0x3a   : > { %1947 = vmatprep.mubr.msk.f32.mxu0 %vm2332_vm0, %v2333_v6 }
  0x3d   : > { %1948 = vmatmul.mubr.msk.f32.gmra.mrb[22].mxu0 %vm302_vm1, %v239_v19  ;;  %v284_v19 = vld [vmem:[%s2399_s7 + $0x1c0] sm:$0xff] }
  0x3e   : > { %1950 = vmatprep.mubr.msk.f32.mxu0 %vm2332_vm0, %v2333_v6 }
  0x41   : > { %1951 = vmatmul.mubr.msk.f32.gmra.mrb[24].mxu0 %vm302_vm1, %v240_v20 }
  0x42   : > { %1953 = vmatprep.mubr.msk.f32.mxu0 %vm2332_vm0, %v2333_v6 }
  0x45   : > { %1954 = vmatmul.mubr.msk.f32.gmra.mrb[26].mxu0 %vm302_vm1, %v241_v21 }
  0x46   : > { %1956 = vmatprep.mubr.msk.f32.mxu0 %vm2332_vm0, %v2333_v6 }
  0x49   : > { %1957 = vmatmul.mubr.msk.f32.gmra.mrb[28].mxu0 %vm302_vm1, %v242_v22 }
  0x4a   : > { %1959 = vmatprep.mubr.msk.f32.mxu0 %vm2332_vm0, %v2333_v6 }
  0x4d   : > { %1960 = vmatmul.mubr.msk.f32.gmra.mrb[30].mxu0 %vm302_vm1, %v243_v23 }
  0x4e   : > { %1962 = vmatprep.mubr.msk.f32.mxu0 %vm2332_vm0, %v2333_v6 }
  0x51   : > { %1963 = vmatmul.mubr.msk.f32.gmra.mrb[32].mxu0 %vm302_vm1, %v244_v24  ;;  %v285_v24 = vld [vmem:[%s2399_s7 + $0x1c8] sm:$0xff] }
  0x52   : > { %1965 = vmatprep.mubr.msk.f32.mxu0 %vm2332_vm0, %v2333_v6 }
  0x55   : > { %1966 = vmatmul.mubr.msk.f32.gmra.mrb[34].mxu0 %vm302_vm1, %v245_v25 }
  0x56   : > { %1968 = vmatprep.mubr.msk.f32.mxu0 %vm2332_vm0, %v2333_v6 }
  0x59   : > { %1969 = vmatmul.mubr.msk.f32.gmra.mrb[36].mxu0 %vm302_vm1, %v246_v26 }
  0x5a   : > { %1971 = vmatprep.mubr.msk.f32.mxu0 %vm2332_vm0, %v2333_v6 }
  0x5d   : > { %1972 = vmatmul.mubr.msk.f32.gmra.mrb[38].mxu0 %vm302_vm1, %v247_v27 }
  0x5e   : > { %1974 = vmatprep.mubr.msk.f32.mxu0 %vm2332_vm0, %v2333_v6 }
  0x61   : > { %1975 = vmatmul.mubr.msk.f32.gmra.mrb[40].mxu0 %vm302_vm1, %v248_v28 }
  0x62   : > { %1977 = vmatprep.mubr.msk.f32.mxu0 %vm2332_vm0, %v2333_v6 }
  0x65   : > { %1978 = vmatmul.mubr.msk.f32.gmra.mrb[42].mxu0 %vm302_vm1, %v249_v32 }
  0x66   : > { %1980 = vmatprep.mubr.msk.f32.mxu0 %vm2332_vm0, %v2333_v6 }
  0x69   : > { %1981 = vmatmul.mubr.msk.f32.gmra.mrb[44].mxu0 %vm302_vm1, %v250_v36 }
  0x6a   : > { %1983 = vmatprep.mubr.msk.f32.mxu0 %vm2332_vm0, %v2333_v6 }
  0x6d   : > { %1984 = vmatmul.mubr.msk.f32.gmra.mrb[46].mxu0 %vm302_vm1, %v251_v37 }
  0x6e   : > { %1986 = vmatprep.mubr.msk.f32.mxu0 %vm2332_vm0, %v2333_v6 }
  0x71   : > { %1987 = vmatmul.mubr.msk.f32.gmra.mrb[48].mxu0 %vm302_vm1, %v252_v38 }
  0x72   : > { %1989 = vmatprep.mubr.msk.f32.mxu0 %vm2332_vm0, %v2333_v6 }
  0x75   : > { %1990 = vmatmul.mubr.msk.f32.gmra.mrb[50].mxu0 %vm302_vm1, %v253_v39  ;;  %v288_v39 = vld [vmem:[%s2399_s7 + $0x1e0] sm:$0xff] }
  0x76   : > { %1992 = vmatprep.mubr.msk.f32.mxu0 %vm2332_vm0, %v2333_v6 }
  0x79   : > { %1993 = vmatmul.mubr.msk.f32.gmra.mrb[52].mxu0 %vm302_vm1, %v254_v40 }
  0x7a   : > { %1995 = vmatprep.mubr.msk.f32.mxu0 %vm2332_vm0, %v2333_v6 }
  0x7d   : > { %1996 = vmatmul.mubr.msk.f32.gmra.mrb[54].mxu0 %vm302_vm1, %v255_v41 }
  0x7e   : > { %1998 = vmatprep.mubr.msk.f32.mxu0 %vm2332_vm0, %v2333_v6 }
  0x81   : > { %1999 = vmatmul.mubr.msk.f32.gmra.mrb[56].mxu0 %vm302_vm1, %v256_v42 }
  0x82   : > { %2001 = vmatprep.mubr.msk.f32.mxu0 %vm2332_vm0, %v2333_v6 }
  0x85   : > { %2002 = vmatmul.mubr.msk.f32.gmra.mrb[58].mxu0 %vm302_vm1, %v257_v43 }
  0x86   : > { %2004 = vmatprep.mubr.msk.f32.mxu0 %vm2332_vm0, %v2333_v6 }
  0x89   : > { %2005 = vmatmul.mubr.msk.f32.gmra.mrb[60].mxu0 %vm302_vm1, %v258_v44  ;;  %v289_v44 = vld [vmem:[%s2399_s7 + $0x1e8] sm:$0xff] }
  0x8a   : > { %2007 = vmatprep.mubr.msk.f32.mxu0 %vm2332_vm0, %v2333_v6 }
  0x8d   : > { %2008 = vmatmul.mubr.msk.f32.gmra.mrb[62].mxu0 %vm302_vm1, %v259_v45 }
  0x8e   : > { %2010 = vmatprep.mubr.msk.f32.mxu0 %vm2332_vm0, %v2333_v6 }
  0x91   : > { %2011 = vmatmul.mubr.msk.f32.gmra.mrb[64].mxu0 %vm302_vm1, %v260_v46 }
  0x92   : > { %2013 = vmatprep.mubr.msk.f32.mxu0 %vm2332_vm0, %v2333_v6 }
  0x95   : > { %2014 = vmatmul.mubr.msk.f32.gmra.mrb[66].mxu0 %vm302_vm1, %v261_v47 }
  0x96   : > { %2016 = vmatprep.mubr.msk.f32.mxu0 %vm2332_vm0, %v2333_v6 }
  0x99   : > { %2017 = vmatmul.mubr.msk.f32.gmra.mrb[68].mxu0 %vm302_vm1, %v262_v48 }
  0x9a   : > { %2019 = vmatprep.mubr.msk.f32.mxu0 %vm2332_vm0, %v2333_v6 }
  0x9d   : > { %2020 = vmatmul.mubr.msk.f32.gmra.mrb[70].mxu0 %vm302_vm1, %v263_v49  ;;  %v290_v49 = vld [vmem:[%s2399_s7 + $0x1f0] sm:$0xff] }
  0x9e   : > { %2022 = vmatprep.mubr.msk.f32.mxu0 %vm2332_vm0, %v2333_v6 }
  0xa1   : > { %2023 = vmatmul.mubr.msk.f32.gmra.mrb[72].mxu0 %vm302_vm1, %v264_v50 }
  0xa2   : > { %2025 = vmatprep.mubr.msk.f32.mxu0 %vm2332_vm0, %v2333_v6 }
  0xa5   : > { %2026 = vmatmul.mubr.msk.f32.gmra.mrb[74].mxu0 %vm302_vm1, %v265_v51 }
  0xa6   : > { %2028 = vmatprep.mubr.msk.f32.mxu0 %vm2332_vm0, %v2333_v6 }
  0xa9   : > { %2029 = vmatmul.mubr.msk.f32.gmra.mrb[76].mxu0 %vm302_vm1, %v266_v52 }
  0xaa   : > { %2031 = vmatprep.mubr.msk.f32.mxu0 %vm2332_vm0, %v2333_v6 }
  0xad   : > { %2032 = vmatmul.mubr.msk.f32.gmra.mrb[78].mxu0 %vm302_vm1, %v267_v53 }
  0xae   : > { %2034 = vmatprep.mubr.msk.f32.mxu0 %vm2332_vm0, %v2333_v6 }
  0xb1   : > { %2035 = vmatmul.mubr.msk.f32.gmra.mrb[80].mxu0 %vm302_vm1, %v268_v54 }
  0xb2   : > { %2037 = vmatprep.mubr.msk.f32.mxu0 %vm2332_vm0, %v2333_v6 }
  0xb5   : > { %2038 = vmatmul.mubr.msk.f32.gmra.mrb[82].mxu0 %vm302_vm1, %v269_v55 }
  0xb6   : > { %2040 = vmatprep.mubr.msk.f32.mxu0 %vm2332_vm0, %v2333_v6 }
  0xb9   : > { %2041 = vmatmul.mubr.msk.f32.gmra.mrb[84].mxu0 %vm302_vm1, %v270_v56 }
  0xba   : > { %2043 = vmatprep.mubr.msk.f32.mxu0 %vm2332_vm0, %v2333_v6 }
  0xbd   : > { %2044 = vmatmul.mubr.msk.f32.gmra.mrb[86].mxu0 %vm302_vm1, %v271_v57 }
  0xbe   : > { %2046 = vmatprep.mubr.msk.f32.mxu0 %vm2332_vm0, %v2333_v6 }
  0xc1   : > { %2047 = vmatmul.mubr.msk.f32.gmra.mrb[88].mxu0 %vm302_vm1, %v272_v58 }
  0xc2   : > { %2049 = vmatprep.mubr.msk.f32.mxu0 %vm2332_vm0, %v2333_v6 }
  0xc5   : > { %2050 = vmatmul.mubr.msk.f32.gmra.mrb[90].mxu0 %vm302_vm1, %v273_v59 }
  0xc6   : > { %2052 = vmatprep.mubr.msk.f32.mxu0 %vm2332_vm0, %v2333_v6 }
  0xc9   : > { %2053 = vmatmul.mubr.msk.f32.gmra.mrb[92].mxu0 %vm302_vm1, %v274_v60 }
  0xca   : > { %2055 = vmatprep.mubr.msk.f32.mxu0 %vm2332_vm0, %v2333_v6 }
  0xcd   : > { %2056 = vmatmul.mubr.msk.f32.gmra.mrb[94].mxu0 %vm302_vm1, %v275_v61 }
  0xce   : > { %2058 = vmatprep.mubr.msk.f32.mxu0 %vm2332_vm0, %v2333_v6 }
  0xd1   : > { %2059 = vmatmul.mubr.msk.f32.gmra.mrb[96].mxu0 %vm302_vm1, %v276_v62 }
  0xd2   : > { %2061 = vmatprep.mubr.msk.f32.mxu0 %vm2332_vm0, %v2333_v6 }
  0xd5   : > { %2062 = vmatmul.mubr.msk.f32.gmra.mrb[98].mxu0 %vm302_vm1, %v277_v63 }
  0xd6   : > { %2064 = vmatprep.mubr.msk.f32.mxu0 %vm2332_vm0, %v2333_v6 }
  0xd9   : > { %2065 = vmatmul.mubr.msk.f32.gmra.mrb[100].mxu0 %vm302_vm1, %v278_v0 }
  0xda   : > { %2067 = vmatprep.mubr.msk.f32.mxu0 %vm2332_vm0, %v2333_v6 }
  0xdd   : > { %2068 = vmatmul.mubr.msk.f32.gmra.mrb[102].mxu0 %vm302_vm1, %v279_v1 }
  0xde   : > { %2070 = vmatprep.mubr.msk.f32.mxu0 %vm2332_vm0, %v2333_v6 }
  0xe1   : > { %2071 = vmatmul.mubr.msk.f32.gmra.mrb[104].mxu0 %vm302_vm1, %v280_v2 }
  0xe2   : > { %2073 = vmatprep.mubr.msk.f32.mxu0 %vm2332_vm0, %v2333_v6 }
  0xe4   : > { %v558_v5 = vpop.f32.mrb[0].mxu0 }
  0xe5   : > { %v559_v7 = vadd.f32 %v2627_v3, %v558_v5  ;;  %v1916_v8 = vpop.f32.mrb[1].mxu0  ;;  %2074 = vmatmul.mubr.msk.f32.gmra.mrb[106].mxu0 %vm302_vm1, %v281_v4 }
  0xe6   : > { %2076 = vmatprep.mubr.msk.f32.mxu0 %vm2332_vm0, %v2333_v6 }
  0xe7   : > { %v872_v10 = vmax.f32 %v559_v7, 0.0 }
  0xe8   : > { %v563_v11 = vpop.f32.mrb[2].mxu0 }
  0xe9   : > { %v564_v12 = vadd.f32 %v2627_v3, %v563_v11  ;;  %v1919_v13 = vpop.f32.mrb[3].mxu0  ;;  %2077 = vmatmul.mubr.msk.f32.gmra.mrb[108].mxu0 %vm302_vm1, %v282_v9  ;;  %2112 = vmatmul.mubr.msk.f32.vlgmr.msra.gmra.mrb[0].mxu1 %vm302_vm1, %v872_v10 }
  0xea   : > { %2079 = vmatprep.mubr.msk.f32.mxu0 %vm2332_vm0, %v2333_v6  ;;  %2114 = vmatprep.mubr.msk.f32.mxu1 %vm2332_vm0, %v2333_v6 }
  0xeb   : > { %v873_v15 = vmax.f32 %v564_v12, 0.0 }
  0xec   : > { %v568_v16 = vpop.f32.mrb[4].mxu0 }
  0xed   : > { %v569_v17 = vadd.f32 %v2627_v3, %v568_v16  ;;  %v1922_v18 = vpop.f32.mrb[5].mxu0  ;;  %2080 = vmatmul.mubr.msk.f32.gmra.mrb[110].mxu0 %vm302_vm1, %v283_v14  ;;  %2115 = vmatmul.mubr.msk.f32.gmra.mrb[2].mxu1 %vm302_vm1, %v873_v15 }
  0xee   : > { %2082 = vmatprep.mubr.msk.f32.mxu0 %vm2332_vm0, %v2333_v6  ;;  %2117 = vmatprep.mubr.msk.f32.mxu1 %vm2332_vm0, %v2333_v6 }
  0xef   : > { %v874_v20 = vmax.f32 %v569_v17, 0.0 }
  0xf0   : > { %v573_v21 = vpop.f32.mrb[6].mxu0 }
  0xf1   : > { %v574_v22 = vadd.f32 %v2627_v3, %v573_v21  ;;  %v1925_v23 = vpop.f32.mrb[7].mxu0  ;;  %2083 = vmatmul.mubr.msk.f32.gmra.mrb[112].mxu0 %vm302_vm1, %v284_v19  ;;  %2118 = vmatmul.mubr.msk.f32.gmra.mrb[4].mxu1 %vm302_vm1, %v874_v20 }
  0xf2   : > { %2085 = vmatprep.mubr.msk.f32.mxu0 %vm2332_vm0, %v2333_v6  ;;  %2120 = vmatprep.mubr.msk.f32.mxu1 %vm2332_vm0, %v2333_v6 }
  0xf3   : > { %v875_v25 = vmax.f32 %v574_v22, 0.0 }
  0xf4   : > { %v578_v26 = vpop.f32.mrb[8].mxu0 }
  0xf5   : > { %v579_v27 = vadd.f32 %v2627_v3, %v578_v26  ;;  %v1928_v28 = vpop.f32.mrb[9].mxu0  ;;  %2086 = vmatmul.mubr.msk.f32.gmra.mrb[114].mxu0 %vm302_vm1, %v285_v24  ;;  %2121 = vmatmul.mubr.msk.f32.gmra.mrb[6].mxu1 %vm302_vm1, %v875_v25 }
  0xf6   : > { %2088 = vmatprep.mubr.msk.f32.mxu0 %vm2332_vm0, %v2333_v6  ;;  %2123 = vmatprep.mubr.msk.f32.mxu1 %vm2332_vm0, %v2333_v6 }
  0xf7   : > { %v876_v30 = vmax.f32 %v579_v27, 0.0 }
  0xf8   : > { %v583_v31 = vpop.f32.mrb[10].mxu0 }
  0xf9   : > { %v584_v32 = vadd.f32 %v2627_v3, %v583_v31  ;;  %v1931_v33 = vpop.f32.mrb[11].mxu0  ;;  %2089 = vmatmul.mubr.msk.f32.gmra.mrb[116].mxu0 %vm302_vm1, %v286_v29  ;;  %2124 = vmatmul.mubr.msk.f32.gmra.mrb[8].mxu1 %vm302_vm1, %v876_v30 }
  0xfa   : > { %2091 = vmatprep.mubr.msk.f32.mxu0 %vm2332_vm0, %v2333_v6  ;;  %2126 = vmatprep.mubr.msk.f32.mxu1 %vm2332_vm0, %v2333_v6 }
  0xfb   : > { %v877_v35 = vmax.f32 %v584_v32, 0.0 }
  0xfc   : > { %v588_v36 = vpop.f32.mrb[12].mxu0 }
  0xfd   : > { %v589_v37 = vadd.f32 %v2627_v3, %v588_v36  ;;  %v1934_v38 = vpop.f32.mrb[13].mxu0  ;;  %2092 = vmatmul.mubr.msk.f32.gmra.mrb[118].mxu0 %vm302_vm1, %v287_v34  ;;  %2127 = vmatmul.mubr.msk.f32.gmra.mrb[10].mxu1 %vm302_vm1, %v877_v35 }
  0xfe   : > { %2094 = vmatprep.mubr.msk.f32.mxu0 %vm2332_vm0, %v2333_v6  ;;  %2129 = vmatprep.mubr.msk.f32.mxu1 %vm2332_vm0, %v2333_v6 }
  0xff   : > { %v878_v40 = vmax.f32 %v589_v37, 0.0 }
 0x100   : > { %v593_v41 = vpop.f32.mrb[14].mxu0 }
 0x101   : > { %v594_v42 = vadd.f32 %v2627_v3, %v593_v41  ;;  %v1937_v43 = vpop.f32.mrb[15].mxu0  ;;  %2095 = vmatmul.mubr.msk.f32.gmra.mrb[120].mxu0 %vm302_vm1, %v288_v39  ;;  %2130 = vmatmul.mubr.msk.f32.gmra.mrb[12].mxu1 %vm302_vm1, %v878_v40 }
 0x102   : > { %2097 = vmatprep.mubr.msk.f32.mxu0 %vm2332_vm0, %v2333_v6  ;;  %2132 = vmatprep.mubr.msk.f32.mxu1 %vm2332_vm0, %v2333_v6 }
 0x103   : > { %v879_v45 = vmax.f32 %v594_v42, 0.0 }
 0x104   : > { %v598_v46 = vpop.f32.mrb[16].mxu0 }
 0x105   : > { %v599_v47 = vadd.f32 %v2627_v3, %v598_v46  ;;  %v1940_v48 = vpop.f32.mrb[17].mxu0  ;;  %2098 = vmatmul.mubr.msk.f32.gmra.mrb[122].mxu0 %vm302_vm1, %v289_v44  ;;  %2133 = vmatmul.mubr.msk.f32.gmra.mrb[14].mxu1 %vm302_vm1, %v879_v45 }
 0x106   : > { %2100 = vmatprep.mubr.msk.f32.mxu0 %vm2332_vm0, %v2333_v6  ;;  %2135 = vmatprep.mubr.msk.f32.mxu1 %vm2332_vm0, %v2333_v6 }
 0x107   : > { %v880_v50 = vmax.f32 %v599_v47, 0.0 }
 0x108   : > { %v603_v51 = vpop.f32.mrb[18].mxu0 }
 0x109   : > { %v604_v52 = vadd.f32 %v2627_v3, %v603_v51  ;;  %v1943_v53 = vpop.f32.mrb[19].mxu0  ;;  %2101 = vmatmul.mubr.msk.f32.gmra.mrb[124].mxu0 %vm302_vm1, %v290_v49  ;;  %2136 = vmatmul.mubr.msk.f32.gmra.mrb[16].mxu1 %vm302_vm1, %v880_v50 }
 0x10a   : > { %2138 = vmatprep.mubr.msk.f32.mxu1 %vm2332_vm0, %v2333_v6 }
 0x10b   : > { %v881_v54 = vmax.f32 %v604_v52, 0.0 }
 0x10c   : > { %v608_v55 = vpop.f32.mrb[20].mxu0 }
 0x10d   : > { %v609_v56 = vadd.f32 %v2627_v3, %v608_v55  ;;  %v1946_v57 = vpop.f32.mrb[21].mxu0  ;;  %2139 = vmatmul.mubr.msk.f32.gmra.mrb[18].mxu1 %vm302_vm1, %v881_v54 }
 0x10e   : > { %2141 = vmatprep.mubr.msk.f32.mxu1 %vm2332_vm0, %v2333_v6 }
 0x10f   : > { %v882_v58 = vmax.f32 %v609_v56, 0.0 }
 0x110   : > { %v613_v59 = vpop.f32.mrb[22].mxu0 }
 0x111   : > { %v614_v60 = vadd.f32 %v2627_v3, %v613_v59  ;;  %v1949_v61 = vpop.f32.mrb[23].mxu0  ;;  %2142 = vmatmul.mubr.msk.f32.gmra.mrb[20].mxu1 %vm302_vm1, %v882_v58 }
 0x112   : > { %2144 = vmatprep.mubr.msk.f32.mxu1 %vm2332_vm0, %v2333_v6 }
 0x113   : > { %v883_v62 = vmax.f32 %v614_v60, 0.0 }
 0x114   : > { %v618_v63 = vpop.f32.mrb[24].mxu0 }
 0x115   : > { %v619_v0 = vadd.f32 %v2627_v3, %v618_v63  ;;  %v1952_v1 = vpop.f32.mrb[25].mxu0  ;;  %2145 = vmatmul.mubr.msk.f32.gmra.mrb[22].mxu1 %vm302_vm1, %v883_v62 }
 0x116   : > { %2147 = vmatprep.mubr.msk.f32.mxu1 %vm2332_vm0, %v2333_v6 }
 0x117   : > { %v884_v2 = vmax.f32 %v619_v0, 0.0 }
 0x118   : > { %v623_v4 = vpop.f32.mrb[26].mxu0 }
 0x119   : > { %v624_v5 = vadd.f32 %v2627_v3, %v623_v4  ;;  %v1955_v7 = vpop.f32.mrb[27].mxu0  ;;  %2148 = vmatmul.mubr.msk.f32.gmra.mrb[24].mxu1 %vm302_vm1, %v884_v2 }
 0x11a   : > { %2150 = vmatprep.mubr.msk.f32.mxu1 %vm2332_vm0, %v2333_v6 }
 0x11b   : > { %v885_v8 = vmax.f32 %v624_v5, 0.0 }
 0x11c   : > { %v628_v9 = vpop.f32.mrb[28].mxu0 }
 0x11d   : > { %v629_v10 = vadd.f32 %v2627_v3, %v628_v9  ;;  %v1958_v11 = vpop.f32.mrb[29].mxu0  ;;  %2151 = vmatmul.mubr.msk.f32.gmra.mrb[26].mxu1 %vm302_vm1, %v885_v8 }
 0x11e   : > { %2153 = vmatprep.mubr.msk.f32.mxu1 %vm2332_vm0, %v2333_v6 }
 0x11f   : > { %v886_v12 = vmax.f32 %v629_v10, 0.0 }
 0x120   : > { %v633_v13 = vpop.f32.mrb[30].mxu0 }
 0x121   : > { %v634_v14 = vadd.f32 %v2627_v3, %v633_v13  ;;  %v1961_v15 = vpop.f32.mrb[31].mxu0  ;;  %2154 = vmatmul.mubr.msk.f32.gmra.mrb[28].mxu1 %vm302_vm1, %v886_v12 }
 0x122   : > { %2156 = vmatprep.mubr.msk.f32.mxu1 %vm2332_vm0, %v2333_v6 }
 0x123   : > { %v887_v16 = vmax.f32 %v634_v14, 0.0 }
 0x124   : > { %v638_v17 = vpop.f32.mrb[32].mxu0 }
 0x125   : > { %v639_v18 = vadd.f32 %v2627_v3, %v638_v17  ;;  %v1964_v19 = vpop.f32.mrb[33].mxu0  ;;  %2157 = vmatmul.mubr.msk.f32.gmra.mrb[30].mxu1 %vm302_vm1, %v887_v16 }
 0x126   : > { %2159 = vmatprep.mubr.msk.f32.mxu1 %vm2332_vm0, %v2333_v6 }
 0x127   : > { %v888_v20 = vmax.f32 %v639_v18, 0.0 }
 0x128   : > { %v643_v21 = vpop.f32.mrb[34].mxu0 }
 0x129   : > { %v644_v22 = vadd.f32 %v2627_v3, %v643_v21  ;;  %v1967_v23 = vpop.f32.mrb[35].mxu0  ;;  %2160 = vmatmul.mubr.msk.f32.gmra.mrb[32].mxu1 %vm302_vm1, %v888_v20 }
 0x12a   : > { %2162 = vmatprep.mubr.msk.f32.mxu1 %vm2332_vm0, %v2333_v6 }
 0x12b   : > { %v889_v24 = vmax.f32 %v644_v22, 0.0 }
 0x12c   : > { %v648_v25 = vpop.f32.mrb[36].mxu0 }
 0x12d   : > { %v649_v26 = vadd.f32 %v2627_v3, %v648_v25  ;;  %v1970_v27 = vpop.f32.mrb[37].mxu0  ;;  %2163 = vmatmul.mubr.msk.f32.gmra.mrb[34].mxu1 %vm302_vm1, %v889_v24 }
 0x12e   : > { %2165 = vmatprep.mubr.msk.f32.mxu1 %vm2332_vm0, %v2333_v6 }
 0x12f   : > { %v890_v28 = vmax.f32 %v649_v26, 0.0 }
 0x130   : > { %v653_v29 = vpop.f32.mrb[38].mxu0 }
 0x131   : > { %v654_v30 = vadd.f32 %v2627_v3, %v653_v29  ;;  %v1973_v31 = vpop.f32.mrb[39].mxu0  ;;  %2166 = vmatmul.mubr.msk.f32.gmra.mrb[36].mxu1 %vm302_vm1, %v890_v28 }
 0x132   : > { %2168 = vmatprep.mubr.msk.f32.mxu1 %vm2332_vm0, %v2333_v6 }
 0x133   : > { %v891_v32 = vmax.f32 %v654_v30, 0.0 }
 0x134   : > { %v658_v33 = vpop.f32.mrb[40].mxu0 }
 0x135   : > { %v659_v34 = vadd.f32 %v2627_v3, %v658_v33  ;;  %v1976_v35 = vpop.f32.mrb[41].mxu0  ;;  %2169 = vmatmul.mubr.msk.f32.gmra.mrb[38].mxu1 %vm302_vm1, %v891_v32 }
 0x136   : > { %2171 = vmatprep.mubr.msk.f32.mxu1 %vm2332_vm0, %v2333_v6 }
 0x137   : > { %v892_v36 = vmax.f32 %v659_v34, 0.0 }
 0x138   : > { %v663_v37 = vpop.f32.mrb[42].mxu0 }
 0x139   : > { %v664_v38 = vadd.f32 %v2627_v3, %v663_v37  ;;  %v1979_v39 = vpop.f32.mrb[43].mxu0  ;;  %2172 = vmatmul.mubr.msk.f32.gmra.mrb[40].mxu1 %vm302_vm1, %v892_v36 }
 0x13a   : > { %2174 = vmatprep.mubr.msk.f32.mxu1 %vm2332_vm0, %v2333_v6 }
 0x13b   : > { %v893_v40 = vmax.f32 %v664_v38, 0.0 }
 0x13c   : > { %v668_v41 = vpop.f32.mrb[44].mxu0 }
 0x13d   : > { %v669_v42 = vadd.f32 %v2627_v3, %v668_v41  ;;  %v1982_v43 = vpop.f32.mrb[45].mxu0  ;;  %2175 = vmatmul.mubr.msk.f32.gmra.mrb[42].mxu1 %vm302_vm1, %v893_v40 }
 0x13e   : > { %2177 = vmatprep.mubr.msk.f32.mxu1 %vm2332_vm0, %v2333_v6 }
 0x13f   : > { %v894_v44 = vmax.f32 %v669_v42, 0.0 }
 0x140   : > { %v673_v45 = vpop.f32.mrb[46].mxu0 }
 0x141   : > { %v674_v46 = vadd.f32 %v2627_v3, %v673_v45  ;;  %v1985_v47 = vpop.f32.mrb[47].mxu0  ;;  %2178 = vmatmul.mubr.msk.f32.gmra.mrb[44].mxu1 %vm302_vm1, %v894_v44 }
 0x142   : > { %2180 = vmatprep.mubr.msk.f32.mxu1 %vm2332_vm0, %v2333_v6 }
 0x143   : > { %v895_v48 = vmax.f32 %v674_v46, 0.0 }
 0x144   : > { %v678_v49 = vpop.f32.mrb[48].mxu0 }
 0x145   : > { %v679_v50 = vadd.f32 %v2627_v3, %v678_v49  ;;  %v1988_v51 = vpop.f32.mrb[49].mxu0  ;;  %2181 = vmatmul.mubr.msk.f32.gmra.mrb[46].mxu1 %vm302_vm1, %v895_v48 }
 0x146   : > { %2183 = vmatprep.mubr.msk.f32.mxu1 %vm2332_vm0, %v2333_v6 }
 0x147   : > { %v896_v52 = vmax.f32 %v679_v50, 0.0 }
 0x148   : > { %v683_v53 = vpop.f32.mrb[50].mxu0 }
 0x149   : > { %v684_v54 = vadd.f32 %v2627_v3, %v683_v53  ;;  %v1991_v55 = vpop.f32.mrb[51].mxu0  ;;  %2184 = vmatmul.mubr.msk.f32.gmra.mrb[48].mxu1 %vm302_vm1, %v896_v52 }
 0x14a   : > { %2186 = vmatprep.mubr.msk.f32.mxu1 %vm2332_vm0, %v2333_v6 }
 0x14b   : > { %v897_v56 = vmax.f32 %v684_v54, 0.0 }
 0x14c   : > { %v688_v57 = vpop.f32.mrb[52].mxu0 }
 0x14d   : > { %v689_v58 = vadd.f32 %v2627_v3, %v688_v57  ;;  %v1994_v59 = vpop.f32.mrb[53].mxu0  ;;  %2187 = vmatmul.mubr.msk.f32.gmra.mrb[50].mxu1 %vm302_vm1, %v897_v56 }
 0x14e   : > { %2189 = vmatprep.mubr.msk.f32.mxu1 %vm2332_vm0, %v2333_v6 }
 0x14f   : > { %v898_v60 = vmax.f32 %v689_v58, 0.0 }
 0x150   : > { %v693_v61 = vpop.f32.mrb[54].mxu0 }
 0x151   : > { %v694_v62 = vadd.f32 %v2627_v3, %v693_v61  ;;  %v1997_v63 = vpop.f32.mrb[55].mxu0  ;;  %2190 = vmatmul.mubr.msk.f32.gmra.mrb[52].mxu1 %vm302_vm1, %v898_v60 }
 0x152   : > { %2192 = vmatprep.mubr.msk.f32.mxu1 %vm2332_vm0, %v2333_v6 }
 0x153   : > { %v899_v0 = vmax.f32 %v694_v62, 0.0 }
 0x154   : > { %v698_v1 = vpop.f32.mrb[56].mxu0 }
 0x155   : > { %v699_v2 = vadd.f32 %v2627_v3, %v698_v1  ;;  %v2000_v4 = vpop.f32.mrb[57].mxu0  ;;  %2193 = vmatmul.mubr.msk.f32.gmra.mrb[54].mxu1 %vm302_vm1, %v899_v0 }
 0x156   : > { %2195 = vmatprep.mubr.msk.f32.mxu1 %vm2332_vm0, %v2333_v6 }
 0x157   : > { %v900_v5 = vmax.f32 %v699_v2, 0.0 }
 0x158   : > { %v703_v7 = vpop.f32.mrb[58].mxu0 }
 0x159   : > { %v704_v8 = vadd.f32 %v2627_v3, %v703_v7  ;;  %v2003_v9 = vpop.f32.mrb[59].mxu0  ;;  %2196 = vmatmul.mubr.msk.f32.gmra.mrb[56].mxu1 %vm302_vm1, %v900_v5 }
 0x15a   : > { %2198 = vmatprep.mubr.msk.f32.mxu1 %vm2332_vm0, %v2333_v6 }
 0x15b   : > { %v901_v10 = vmax.f32 %v704_v8, 0.0 }
 0x15c   : > { %v708_v11 = vpop.f32.mrb[60].mxu0 }
 0x15d   : > { %v709_v12 = vadd.f32 %v2627_v3, %v708_v11  ;;  %v2006_v13 = vpop.f32.mrb[61].mxu0  ;;  %2199 = vmatmul.mubr.msk.f32.gmra.mrb[58].mxu1 %vm302_vm1, %v901_v10 }
 0x15e   : > { %2201 = vmatprep.mubr.msk.f32.mxu1 %vm2332_vm0, %v2333_v6 }
 0x15f   : > { %v902_v14 = vmax.f32 %v709_v12, 0.0 }
 0x160   : > { %v713_v15 = vpop.f32.mrb[62].mxu0 }
 0x161   : > { %v714_v16 = vadd.f32 %v2627_v3, %v713_v15  ;;  %v2009_v17 = vpop.f32.mrb[63].mxu0  ;;  %2202 = vmatmul.mubr.msk.f32.gmra.mrb[60].mxu1 %vm302_vm1, %v902_v14 }
 0x162   : > { %2204 = vmatprep.mubr.msk.f32.mxu1 %vm2332_vm0, %v2333_v6 }
 0x163   : > { %v903_v18 = vmax.f32 %v714_v16, 0.0 }
 0x164   : > { %v718_v19 = vpop.f32.mrb[64].mxu0 }
 0x165   : > { %v719_v20 = vadd.f32 %v2627_v3, %v718_v19  ;;  %v2012_v21 = vpop.f32.mrb[65].mxu0  ;;  %2205 = vmatmul.mubr.msk.f32.gmra.mrb[62].mxu1 %vm302_vm1, %v903_v18 }
 0x166   : > { %2207 = vmatprep.mubr.msk.f32.mxu1 %vm2332_vm0, %v2333_v6 }
 0x167   : > { %v904_v22 = vmax.f32 %v719_v20, 0.0 }
 0x168   : > { %v723_v23 = vpop.f32.mrb[66].mxu0 }
 0x169   : > { %v724_v24 = vadd.f32 %v2627_v3, %v723_v23  ;;  %v2015_v25 = vpop.f32.mrb[67].mxu0  ;;  %2208 = vmatmul.mubr.msk.f32.gmra.mrb[64].mxu1 %vm302_vm1, %v904_v22 }
 0x16a   : > { %2210 = vmatprep.mubr.msk.f32.mxu1 %vm2332_vm0, %v2333_v6 }
 0x16b   : > { %v905_v26 = vmax.f32 %v724_v24, 0.0 }
 0x16c   : > { %v728_v27 = vpop.f32.mrb[68].mxu0 }
 0x16d   : > { %v729_v28 = vadd.f32 %v2627_v3, %v728_v27  ;;  %v2018_v29 = vpop.f32.mrb[69].mxu0  ;;  %2211 = vmatmul.mubr.msk.f32.gmra.mrb[66].mxu1 %vm302_vm1, %v905_v26 }
 0x16e   : > { %2213 = vmatprep.mubr.msk.f32.mxu1 %vm2332_vm0, %v2333_v6 }
 0x16f   : > { %v906_v30 = vmax.f32 %v729_v28, 0.0 }
 0x170   : > { %v733_v31 = vpop.f32.mrb[70].mxu0 }
 0x171   : > { %v734_v32 = vadd.f32 %v2627_v3, %v733_v31  ;;  %v2021_v33 = vpop.f32.mrb[71].mxu0  ;;  %2214 = vmatmul.mubr.msk.f32.gmra.mrb[68].mxu1 %vm302_vm1, %v906_v30 }
 0x172   : > { %2216 = vmatprep.mubr.msk.f32.mxu1 %vm2332_vm0, %v2333_v6 }
 0x173   : > { %v907_v34 = vmax.f32 %v734_v32, 0.0 }
 0x174   : > { %v738_v35 = vpop.f32.mrb[72].mxu0 }
 0x175   : > { %v739_v36 = vadd.f32 %v2627_v3, %v738_v35  ;;  %v2024_v37 = vpop.f32.mrb[73].mxu0  ;;  %2217 = vmatmul.mubr.msk.f32.gmra.mrb[70].mxu1 %vm302_vm1, %v907_v34 }
 0x176   : > { %2219 = vmatprep.mubr.msk.f32.mxu1 %vm2332_vm0, %v2333_v6 }
 0x177   : > { %v908_v38 = vmax.f32 %v739_v36, 0.0 }
 0x178   : > { %v743_v39 = vpop.f32.mrb[74].mxu0 }
 0x179   : > { %v744_v40 = vadd.f32 %v2627_v3, %v743_v39  ;;  %v2027_v41 = vpop.f32.mrb[75].mxu0  ;;  %2220 = vmatmul.mubr.msk.f32.gmra.mrb[72].mxu1 %vm302_vm1, %v908_v38 }
 0x17a   : > { %2222 = vmatprep.mubr.msk.f32.mxu1 %vm2332_vm0, %v2333_v6 }
 0x17b   : > { %v909_v42 = vmax.f32 %v744_v40, 0.0 }
 0x17c   : > { %v748_v43 = vpop.f32.mrb[76].mxu0 }
 0x17d   : > { %v749_v44 = vadd.f32 %v2627_v3, %v748_v43  ;;  %v2030_v45 = vpop.f32.mrb[77].mxu0  ;;  %2223 = vmatmul.mubr.msk.f32.gmra.mrb[74].mxu1 %vm302_vm1, %v909_v42 }
 0x17e   : > { %2225 = vmatprep.mubr.msk.f32.mxu1 %vm2332_vm0, %v2333_v6 }
 0x17f   : > { %v910_v46 = vmax.f32 %v749_v44, 0.0  ;;  %v2883_v44 = vld [vmem:[%s3127_s4] ss:$0 sm:$0xff] }
 0x180   : > { %v753_v47 = vpop.f32.mrb[78].mxu0 }
 0x181   : > { %v754_v48 = vadd.f32 %v2627_v3, %v753_v47  ;;  %v2033_v49 = vpop.f32.mrb[79].mxu0  ;;  %2226 = vmatmul.mubr.msk.f32.gmra.mrb[76].mxu1 %vm302_vm1, %v910_v46 }
 0x182   : > { %2228 = vmatprep.mubr.msk.f32.mxu1 %vm2332_vm0, %v2333_v6 }
 0x183   : > { %v911_v50 = vmax.f32 %v754_v48, 0.0 }
 0x184   : > { %v758_v51 = vpop.f32.mrb[80].mxu0 }
 0x185   : > { %v759_v52 = vadd.f32 %v2627_v3, %v758_v51  ;;  %v2036_v53 = vpop.f32.mrb[81].mxu0  ;;  %2229 = vmatmul.mubr.msk.f32.gmra.mrb[78].mxu1 %vm302_vm1, %v911_v50 }
 0x186   : > { %2231 = vmatprep.mubr.msk.f32.mxu1 %vm2332_vm0, %v2333_v6 }
 0x187   : > { %v912_v54 = vmax.f32 %v759_v52, 0.0 }
 0x188   : > { %v763_v55 = vpop.f32.mrb[82].mxu0 }
 0x189   : > { %v764_v56 = vadd.f32 %v2627_v3, %v763_v55  ;;  %v2039_v57 = vpop.f32.mrb[83].mxu0  ;;  %2232 = vmatmul.mubr.msk.f32.gmra.mrb[80].mxu1 %vm302_vm1, %v912_v54 }
 0x18a   : > { %2234 = vmatprep.mubr.msk.f32.mxu1 %vm2332_vm0, %v2333_v6 }
 0x18b   : > { %v913_v58 = vmax.f32 %v764_v56, 0.0 }
 0x18c   : > { %v768_v59 = vpop.f32.mrb[84].mxu0 }
 0x18d   : > { %v769_v60 = vadd.f32 %v2627_v3, %v768_v59  ;;  %v2042_v61 = vpop.f32.mrb[85].mxu0  ;;  %2235 = vmatmul.mubr.msk.f32.gmra.mrb[82].mxu1 %vm302_vm1, %v913_v58 }
 0x18e   : > { %2237 = vmatprep.mubr.msk.f32.mxu1 %vm2332_vm0, %v2333_v6 }
 0x18f   : > { %v914_v62 = vmax.f32 %v769_v60, 0.0 }
 0x190   : > { %v773_v63 = vpop.f32.mrb[86].mxu0 }
 0x191   : > { %v774_v0 = vadd.f32 %v2627_v3, %v773_v63  ;;  %v2045_v1 = vpop.f32.mrb[87].mxu0  ;;  %2238 = vmatmul.mubr.msk.f32.gmra.mrb[84].mxu1 %vm302_vm1, %v914_v62 }
 0x192   : > { %2240 = vmatprep.mubr.msk.f32.mxu1 %vm2332_vm0, %v2333_v6 }
 0x193   : > { %v915_v2 = vmax.f32 %v774_v0, 0.0 }
 0x194   : > { %v778_v4 = vpop.f32.mrb[88].mxu0 }
 0x195   : > { %v779_v5 = vadd.f32 %v2627_v3, %v778_v4  ;;  %v2048_v7 = vpop.f32.mrb[89].mxu0  ;;  %2241 = vmatmul.mubr.msk.f32.gmra.mrb[86].mxu1 %vm302_vm1, %v915_v2 }
 0x196   : > { %2243 = vmatprep.mubr.msk.f32.mxu1 %vm2332_vm0, %v2333_v6 }
 0x197   : > { %v916_v8 = vmax.f32 %v779_v5, 0.0 }
 0x198   : > { %v783_v9 = vpop.f32.mrb[90].mxu0 }
 0x199   : > { %v784_v10 = vadd.f32 %v2627_v3, %v783_v9  ;;  %v2051_v11 = vpop.f32.mrb[91].mxu0  ;;  %2244 = vmatmul.mubr.msk.f32.gmra.mrb[88].mxu1 %vm302_vm1, %v916_v8 }
 0x19a   : > { %2246 = vmatprep.mubr.msk.f32.mxu1 %vm2332_vm0, %v2333_v6 }
 0x19b   : > { %v917_v12 = vmax.f32 %v784_v10, 0.0 }
 0x19c   : > { %v788_v13 = vpop.f32.mrb[92].mxu0 }
 0x19d   : > { %v789_v14 = vadd.f32 %v2627_v3, %v788_v13  ;;  %v2054_v15 = vpop.f32.mrb[93].mxu0  ;;  %2247 = vmatmul.mubr.msk.f32.gmra.mrb[90].mxu1 %vm302_vm1, %v917_v12 }
 0x19e   : > { %2249 = vmatprep.mubr.msk.f32.mxu1 %vm2332_vm0, %v2333_v6 }
 0x19f   : > { %v918_v16 = vmax.f32 %v789_v14, 0.0 }
 0x1a0   : > { %v793_v17 = vpop.f32.mrb[94].mxu0 }
 0x1a1   : > { %v794_v18 = vadd.f32 %v2627_v3, %v793_v17  ;;  %v2057_v19 = vpop.f32.mrb[95].mxu0  ;;  %2250 = vmatmul.mubr.msk.f32.gmra.mrb[92].mxu1 %vm302_vm1, %v918_v16 }
 0x1a2   : > { %2252 = vmatprep.mubr.msk.f32.mxu1 %vm2332_vm0, %v2333_v6 }
 0x1a3   : > { %v919_v20 = vmax.f32 %v794_v18, 0.0 }
 0x1a4   : > { %v798_v21 = vpop.f32.mrb[96].mxu0 }
 0x1a5   : > { %v799_v22 = vadd.f32 %v2627_v3, %v798_v21  ;;  %v2060_v23 = vpop.f32.mrb[97].mxu0  ;;  %2253 = vmatmul.mubr.msk.f32.gmra.mrb[94].mxu1 %vm302_vm1, %v919_v20 }
 0x1a6   : > { %2255 = vmatprep.mubr.msk.f32.mxu1 %vm2332_vm0, %v2333_v6 }
 0x1a7   : > { %v920_v24 = vmax.f32 %v799_v22, 0.0 }
 0x1a8   : > { %v803_v25 = vpop.f32.mrb[98].mxu0 }
 0x1a9   : > { %v804_v26 = vadd.f32 %v2627_v3, %v803_v25  ;;  %v2063_v27 = vpop.f32.mrb[99].mxu0  ;;  %2256 = vmatmul.mubr.msk.f32.gmra.mrb[96].mxu1 %vm302_vm1, %v920_v24 }
 0x1aa   : > { %2258 = vmatprep.mubr.msk.f32.mxu1 %vm2332_vm0, %v2333_v6 }
 0x1ab   : > { %v921_v28 = vmax.f32 %v804_v26, 0.0 }
 0x1ac   : > { %v808_v29 = vpop.f32.mrb[100].mxu0 }
 0x1ad   : > { %v809_v30 = vadd.f32 %v2627_v3, %v808_v29  ;;  %v2066_v31 = vpop.f32.mrb[101].mxu0  ;;  %2259 = vmatmul.mubr.msk.f32.gmra.mrb[98].mxu1 %vm302_vm1, %v921_v28 }
 0x1ae   : > { %2261 = vmatprep.mubr.msk.f32.mxu1 %vm2332_vm0, %v2333_v6 }
 0x1af   : > { %v922_v32 = vmax.f32 %v809_v30, 0.0 }
 0x1b0   : > { %v813_v33 = vpop.f32.mrb[102].mxu0 }
 0x1b1   : > { %v814_v34 = vadd.f32 %v2627_v3, %v813_v33  ;;  %v2069_v35 = vpop.f32.mrb[103].mxu0  ;;  %2262 = vmatmul.mubr.msk.f32.gmra.mrb[100].mxu1 %vm302_vm1, %v922_v32 }
 0x1b2   : > { %2264 = vmatprep.mubr.msk.f32.mxu1 %vm2332_vm0, %v2333_v6 }
 0x1b3   : > { %v923_v36 = vmax.f32 %v814_v34, 0.0 }
 0x1b4   : > { %v818_v37 = vpop.f32.mrb[104].mxu0 }
 0x1b5   : > { %v819_v38 = vadd.f32 %v2627_v3, %v818_v37  ;;  %v2072_v39 = vpop.f32.mrb[105].mxu0  ;;  %2265 = vmatmul.mubr.msk.f32.gmra.mrb[102].mxu1 %vm302_vm1, %v923_v36 }
 0x1b6   : > { %2267 = vmatprep.mubr.msk.f32.mxu1 %vm2332_vm0, %v2333_v6 }
 0x1b7   : > { %v924_v40 = vmax.f32 %v819_v38, 0.0 }
 0x1b8   : > { %v823_v41 = vpop.f32.mrb[106].mxu0 }
 0x1b9   : > { %v824_v42 = vadd.f32 %v2627_v3, %v823_v41  ;;  %v2075_v43 = vpop.f32.mrb[107].mxu0  ;;  %2268 = vmatmul.mubr.msk.f32.gmra.mrb[104].mxu1 %vm302_vm1, %v924_v40 }
 0x1ba   : > { %2270 = vmatprep.mubr.msk.f32.mxu1 %vm2332_vm0, %v2333_v6 }
 0x1bb   : > { %v925_v45 = vmax.f32 %v824_v42, 0.0 }
 0x1bc   : > { %v828_v46 = vpop.f32.mrb[108].mxu0  ;;  %v1201_v47 = vpop.f32.mrb[0].mxu1 }
 0x1bd   : > { %v829_v48 = vadd.f32 %v2627_v3, %v828_v46  ;;  %v1202_v49 = vadd.f32 %v2883_v44, %v1201_v47  ;;  %v2078_v50 = vpop.f32.mrb[109].mxu0  ;;  %v2113_v51 = vpop.f32.mrb[1].mxu1  ;;  %2271 = vmatmul.mubr.msk.f32.gmra.mrb[106].mxu1 %vm302_vm1, %v925_v45 }
 0x1be   : > { %2273 = vmatprep.mubr.msk.f32.mxu1 %vm2332_vm0, %v2333_v6 }
 0x1bf   : > { %v926_v52 = vmax.f32 %v829_v48, 0.0  ;;  %1516 = vst.msk [vmem:[%s2892_s23] sm:$0xff] %vm1515_vm2, %v1202_v49 }
 0x1c0   : > { %v833_v53 = vpop.f32.mrb[110].mxu0  ;;  %v1206_v54 = vpop.f32.mrb[2].mxu1 }
 0x1c1   : > { %v834_v55 = vadd.f32 %v2627_v3, %v833_v53  ;;  %v1207_v56 = vadd.f32 %v2883_v44, %v1206_v54  ;;  %v2081_v57 = vpop.f32.mrb[111].mxu0  ;;  %v2116_v58 = vpop.f32.mrb[3].mxu1  ;;  %2274 = vmatmul.mubr.msk.f32.gmra.mrb[108].mxu1 %vm302_vm1, %v926_v52 }
 0x1c2   : > { %2276 = vmatprep.mubr.msk.f32.mxu1 %vm2332_vm0, %v2333_v6 }
 0x1c3   : > { %v927_v59 = vmax.f32 %v834_v55, 0.0  ;;  %1517 = vst.msk [vmem:[%s2892_s23 + $0x8] sm:$0xff] %vm1515_vm2, %v1207_v56 }
 0x1c4   : > { %v838_v60 = vpop.f32.mrb[112].mxu0  ;;  %v1211_v61 = vpop.f32.mrb[4].mxu1 }
 0x1c5   : > { %v839_v62 = vadd.f32 %v2627_v3, %v838_v60  ;;  %v1212_v63 = vadd.f32 %v2883_v44, %v1211_v61  ;;  %v2084_v0 = vpop.f32.mrb[113].mxu0  ;;  %v2119_v1 = vpop.f32.mrb[5].mxu1  ;;  %2277 = vmatmul.mubr.msk.f32.gmra.mrb[110].mxu1 %vm302_vm1, %v927_v59 }
 0x1c6   : > { %2279 = vmatprep.mubr.msk.f32.mxu1 %vm2332_vm0, %v2333_v6 }
 0x1c7   : > { %v928_v2 = vmax.f32 %v839_v62, 0.0  ;;  %1518 = vst.msk [vmem:[%s2892_s23 + $0x10] sm:$0xff] %vm1515_vm2, %v1212_v63 }
 0x1c8   : > { %v843_v4 = vpop.f32.mrb[114].mxu0  ;;  %v1216_v5 = vpop.f32.mrb[6].mxu1 }
 0x1c9   : > { %v844_v7 = vadd.f32 %v2627_v3, %v843_v4  ;;  %v1217_v8 = vadd.f32 %v2883_v44, %v1216_v5  ;;  %v2087_v9 = vpop.f32.mrb[115].mxu0  ;;  %v2122_v10 = vpop.f32.mrb[7].mxu1  ;;  %2280 = vmatmul.mubr.msk.f32.gmra.mrb[112].mxu1 %vm302_vm1, %v928_v2 }
 0x1ca   : > { %2282 = vmatprep.mubr.msk.f32.mxu1 %vm2332_vm0, %v2333_v6 }
 0x1cb   : > { %v929_v11 = vmax.f32 %v844_v7, 0.0  ;;  %1519 = vst.msk [vmem:[%s2892_s23 + $0x18] sm:$0xff] %vm1515_vm2, %v1217_v8 }
 0x1cc   : > { %v848_v12 = vpop.f32.mrb[116].mxu0  ;;  %v1221_v13 = vpop.f32.mrb[8].mxu1 }
 0x1cd   : > { %v849_v14 = vadd.f32 %v2627_v3, %v848_v12  ;;  %v1222_v15 = vadd.f32 %v2883_v44, %v1221_v13  ;;  %v2090_v16 = vpop.f32.mrb[117].mxu0  ;;  %v2125_v17 = vpop.f32.mrb[9].mxu1  ;;  %2283 = vmatmul.mubr.msk.f32.gmra.mrb[114].mxu1 %vm302_vm1, %v929_v11 }
 0x1ce   : > { %2285 = vmatprep.mubr.msk.f32.mxu1 %vm2332_vm0, %v2333_v6 }
 0x1cf   : > { %v930_v18 = vmax.f32 %v849_v14, 0.0  ;;  %1520 = vst.msk [vmem:[%s2892_s23 + $0x20] sm:$0xff] %vm1515_vm2, %v1222_v15 }
 0x1d0   : > { %v853_v19 = vpop.f32.mrb[118].mxu0  ;;  %v1226_v20 = vpop.f32.mrb[10].mxu1 }
 0x1d1   : > { %v854_v21 = vadd.f32 %v2627_v3, %v853_v19  ;;  %v1227_v22 = vadd.f32 %v2883_v44, %v1226_v20  ;;  %v2093_v23 = vpop.f32.mrb[119].mxu0  ;;  %v2128_v24 = vpop.f32.mrb[11].mxu1  ;;  %2286 = vmatmul.mubr.msk.f32.gmra.mrb[116].mxu1 %vm302_vm1, %v930_v18 }
 0x1d2   : > { %2288 = vmatprep.mubr.msk.f32.mxu1 %vm2332_vm0, %v2333_v6 }
 0x1d3   : > { %v931_v25 = vmax.f32 %v854_v21, 0.0  ;;  %1521 = vst.msk [vmem:[%s2892_s23 + $0x28] sm:$0xff] %vm1515_vm2, %v1227_v22 }
 0x1d4   : > { %v858_v26 = vpop.f32.mrb[120].mxu0  ;;  %v1231_v27 = vpop.f32.mrb[12].mxu1 }
 0x1d5   : > { %v859_v28 = vadd.f32 %v2627_v3, %v858_v26  ;;  %v1232_v29 = vadd.f32 %v2883_v44, %v1231_v27  ;;  %v2096_v30 = vpop.f32.mrb[121].mxu0  ;;  %v2131_v31 = vpop.f32.mrb[13].mxu1  ;;  %2289 = vmatmul.mubr.msk.f32.gmra.mrb[118].mxu1 %vm302_vm1, %v931_v25 }
 0x1d6   : > { %2291 = vmatprep.mubr.msk.f32.mxu1 %vm2332_vm0, %v2333_v6 }
 0x1d7   : > { %v932_v32 = vmax.f32 %v859_v28, 0.0  ;;  %1522 = vst.msk [vmem:[%s2892_s23 + $0x30] sm:$0xff] %vm1515_vm2, %v1232_v29 }
 0x1d8   : > { %v863_v33 = vpop.f32.mrb[122].mxu0  ;;  %v1236_v34 = vpop.f32.mrb[14].mxu1 }
 0x1d9   : > { %v864_v35 = vadd.f32 %v2627_v3, %v863_v33  ;;  %v1237_v36 = vadd.f32 %v2883_v44, %v1236_v34  ;;  %v2099_v37 = vpop.f32.mrb[123].mxu0  ;;  %v2134_v38 = vpop.f32.mrb[15].mxu1  ;;  %2292 = vmatmul.mubr.msk.f32.gmra.mrb[120].mxu1 %vm302_vm1, %v932_v32 }
 0x1da   : > { %2294 = vmatprep.mubr.msk.f32.mxu1 %vm2332_vm0, %v2333_v6 }
 0x1db   : > { %v933_v39 = vmax.f32 %v864_v35, 0.0  ;;  %1523 = vst.msk [vmem:[%s2892_s23 + $0x38] sm:$0xff] %vm1515_vm2, %v1237_v36 }
 0x1dc   : > { %v868_v40 = vpop.f32.mrb[124].mxu0  ;;  %v1241_v41 = vpop.f32.mrb[16].mxu1 }
 0x1dd   : > { %v869_v42 = vadd.f32 %v2627_v3, %v868_v40  ;;  %v1242_v43 = vadd.f32 %v2883_v44, %v1241_v41  ;;  %v2102_v45 = vpop.f32.mrb[125].mxu0  ;;  %v2137_v46 = vpop.f32.mrb[17].mxu1  ;;  %2295 = vmatmul.mubr.msk.f32.gmra.mrb[122].mxu1 %vm302_vm1, %v933_v39 }
 0x1de   : > { %2297 = vmatprep.mubr.msk.f32.mxu1 %vm2332_vm0, %v2333_v6 }
 0x1df   : > { %v934_v47 = vmax.f32 %v869_v42, 0.0  ;;  %1524 = vst.msk [vmem:[%s2892_s23 + $0x40] sm:$0xff] %vm1515_vm2, %v1242_v43 }
 0x1e0   : > { %v1246_v48 = vpop.f32.mrb[18].mxu1 }
 0x1e1   : > { %v1247_v49 = vadd.f32 %v2883_v44, %v1246_v48  ;;  %v2140_v50 = vpop.f32.mrb[19].mxu1  ;;  %2298 = vmatmul.mubr.msk.f32.gmra.mrb[124].mxu1 %vm302_vm1, %v934_v47 }
 0x1e3   : > { %1525 = vst.msk [vmem:[%s2892_s23 + $0x48] sm:$0xff] %vm1515_vm2, %v1247_v49 }
 0x1e4   : > { %v1251_v3 = vpop.f32.mrb[20].mxu1 }
 0x1e5   : > { %v1252_v51 = vadd.f32 %v2883_v44, %v1251_v3  ;;  %v2143_v52 = vpop.f32.mrb[21].mxu1 }
 0x1e7   : > { %1526 = vst.msk [vmem:[%s2892_s23 + $0x50] sm:$0xff] %vm1515_vm2, %v1252_v51 }
 0x1e8   : > { %v1256_v6 = vpop.f32.mrb[22].mxu1 }
 0x1e9   : > { %v1257_v53 = vadd.f32 %v2883_v44, %v1256_v6  ;;  %v2146_v54 = vpop.f32.mrb[23].mxu1 }
 0x1eb   : > { %1527 = vst.msk [vmem:[%s2892_s23 + $0x58] sm:$0xff] %vm1515_vm2, %v1257_v53 }
 0x1ec   : > { %v1261_v55 = vpop.f32.mrb[24].mxu1 }
 0x1ed   : > { %v1262_v56 = vadd.f32 %v2883_v44, %v1261_v55  ;;  %v2149_v57 = vpop.f32.mrb[25].mxu1 }
 0x1ef   : > { %1528 = vst.msk [vmem:[%s2892_s23 + $0x60] sm:$0xff] %vm1515_vm2, %v1262_v56 }
 0x1f0   : > { %v1266_v58 = vpop.f32.mrb[26].mxu1 }
 0x1f1   : > { %v1267_v59 = vadd.f32 %v2883_v44, %v1266_v58  ;;  %v2152_v60 = vpop.f32.mrb[27].mxu1 }
 0x1f3   : > { %1529 = vst.msk [vmem:[%s2892_s23 + $0x68] sm:$0xff] %vm1515_vm2, %v1267_v59 }
 0x1f4   : > { %v1271_v61 = vpop.f32.mrb[28].mxu1 }
 0x1f5   : > { %v1272_v62 = vadd.f32 %v2883_v44, %v1271_v61  ;;  %v2155_v63 = vpop.f32.mrb[29].mxu1 }
 0x1f7   : > { %1530 = vst.msk [vmem:[%s2892_s23 + $0x70] sm:$0xff] %vm1515_vm2, %v1272_v62 }
 0x1f8   : > { %v1276_v0 = vpop.f32.mrb[30].mxu1 }
 0x1f9   : > { %v1277_v1 = vadd.f32 %v2883_v44, %v1276_v0  ;;  %v2158_v2 = vpop.f32.mrb[31].mxu1 }
 0x1fb   : > { %1531 = vst.msk [vmem:[%s2892_s23 + $0x78] sm:$0xff] %vm1515_vm2, %v1277_v1 }
 0x1fc   : > { %v1281_v4 = vpop.f32.mrb[32].mxu1 }
 0x1fd   : > { %v1282_v5 = vadd.f32 %v2883_v44, %v1281_v4  ;;  %v2161_v7 = vpop.f32.mrb[33].mxu1 }
 0x1ff   : > { %1532 = vst.msk [vmem:[%s2892_s23 + $0x80] sm:$0xff] %vm1515_vm2, %v1282_v5 }
 0x200   : > { %v1286_v8 = vpop.f32.mrb[34].mxu1 }
 0x201   : > { %v1287_v9 = vadd.f32 %v2883_v44, %v1286_v8  ;;  %v2164_v10 = vpop.f32.mrb[35].mxu1 }
 0x203   : > { %1533 = vst.msk [vmem:[%s2892_s23 + $0x88] sm:$0xff] %vm1515_vm2, %v1287_v9 }
 0x204   : > { %v1291_v11 = vpop.f32.mrb[36].mxu1 }
 0x205   : > { %v1292_v12 = vadd.f32 %v2883_v44, %v1291_v11  ;;  %v2167_v13 = vpop.f32.mrb[37].mxu1 }
 0x207   : > { %1534 = vst.msk [vmem:[%s2892_s23 + $0x90] sm:$0xff] %vm1515_vm2, %v1292_v12 }
 0x208   : > { %v1296_v14 = vpop.f32.mrb[38].mxu1 }
 0x209   : > { %v1297_v15 = vadd.f32 %v2883_v44, %v1296_v14  ;;  %v2170_v16 = vpop.f32.mrb[39].mxu1 }
 0x20b   : > { %1535 = vst.msk [vmem:[%s2892_s23 + $0x98] sm:$0xff] %vm1515_vm2, %v1297_v15 }
 0x20c   : > { %v1301_v17 = vpop.f32.mrb[40].mxu1 }
 0x20d   : > { %v1302_v18 = vadd.f32 %v2883_v44, %v1301_v17  ;;  %v2173_v19 = vpop.f32.mrb[41].mxu1 }
 0x20f   : > { %1536 = vst.msk [vmem:[%s2892_s23 + $0xa0] sm:$0xff] %vm1515_vm2, %v1302_v18 }
 0x210   : > { %v1306_v20 = vpop.f32.mrb[42].mxu1 }
 0x211   : > { %v1307_v21 = vadd.f32 %v2883_v44, %v1306_v20  ;;  %v2176_v22 = vpop.f32.mrb[43].mxu1 }
 0x213   : > { %1537 = vst.msk [vmem:[%s2892_s23 + $0xa8] sm:$0xff] %vm1515_vm2, %v1307_v21 }
 0x214   : > { %v1311_v23 = vpop.f32.mrb[44].mxu1 }
 0x215   : > { %v1312_v24 = vadd.f32 %v2883_v44, %v1311_v23  ;;  %v2179_v25 = vpop.f32.mrb[45].mxu1 }
 0x217   : > { %1538 = vst.msk [vmem:[%s2892_s23 + $0xb0] sm:$0xff] %vm1515_vm2, %v1312_v24 }
 0x218   : > { %v1316_v26 = vpop.f32.mrb[46].mxu1 }
 0x219   : > { %v1317_v27 = vadd.f32 %v2883_v44, %v1316_v26  ;;  %v2182_v28 = vpop.f32.mrb[47].mxu1 }
 0x21b   : > { %1539 = vst.msk [vmem:[%s2892_s23 + $0xb8] sm:$0xff] %vm1515_vm2, %v1317_v27 }
 0x21c   : > { %v1321_v29 = vpop.f32.mrb[48].mxu1 }
 0x21d   : > { %v1322_v30 = vadd.f32 %v2883_v44, %v1321_v29  ;;  %v2185_v31 = vpop.f32.mrb[49].mxu1 }
 0x21f   : > { %1540 = vst.msk [vmem:[%s2892_s23 + $0xc0] sm:$0xff] %vm1515_vm2, %v1322_v30 }
 0x220   : > { %v1326_v32 = vpop.f32.mrb[50].mxu1 }
 0x221   : > { %v1327_v33 = vadd.f32 %v2883_v44, %v1326_v32  ;;  %v2188_v34 = vpop.f32.mrb[51].mxu1 }
 0x223   : > { %1541 = vst.msk [vmem:[%s2892_s23 + $0xc8] sm:$0xff] %vm1515_vm2, %v1327_v33 }
 0x224   : > { %v1331_v35 = vpop.f32.mrb[52].mxu1 }
 0x225   : > { %v1332_v36 = vadd.f32 %v2883_v44, %v1331_v35  ;;  %v2191_v37 = vpop.f32.mrb[53].mxu1 }
 0x227   : > { %1542 = vst.msk [vmem:[%s2892_s23 + $0xd0] sm:$0xff] %vm1515_vm2, %v1332_v36 }
 0x228   : > { %v1336_v38 = vpop.f32.mrb[54].mxu1 }
 0x229   : > { %v1337_v39 = vadd.f32 %v2883_v44, %v1336_v38  ;;  %v2194_v40 = vpop.f32.mrb[55].mxu1 }
 0x22b   : > { %1543 = vst.msk [vmem:[%s2892_s23 + $0xd8] sm:$0xff] %vm1515_vm2, %v1337_v39 }
 0x22c   : > { %v1341_v41 = vpop.f32.mrb[56].mxu1 }
 0x22d   : > { %v1342_v42 = vadd.f32 %v2883_v44, %v1341_v41  ;;  %v2197_v43 = vpop.f32.mrb[57].mxu1 }
 0x22f   : > { %1544 = vst.msk [vmem:[%s2892_s23 + $0xe0] sm:$0xff] %vm1515_vm2, %v1342_v42 }
 0x230   : > { %v1346_v45 = vpop.f32.mrb[58].mxu1 }
 0x231   : > { %v1347_v46 = vadd.f32 %v2883_v44, %v1346_v45  ;;  %v2200_v47 = vpop.f32.mrb[59].mxu1 }
 0x233   : > { %1545 = vst.msk [vmem:[%s2892_s23 + $0xe8] sm:$0xff] %vm1515_vm2, %v1347_v46 }
 0x234   : > { %v1351_v48 = vpop.f32.mrb[60].mxu1 }
 0x235   : > { %v1352_v49 = vadd.f32 %v2883_v44, %v1351_v48  ;;  %v2203_v50 = vpop.f32.mrb[61].mxu1 }
 0x237   : > { %1546 = vst.msk [vmem:[%s2892_s23 + $0xf0] sm:$0xff] %vm1515_vm2, %v1352_v49 }
 0x238   : > { %v1356_v3 = vpop.f32.mrb[62].mxu1 }
 0x239   : > { %v1357_v51 = vadd.f32 %v2883_v44, %v1356_v3  ;;  %v2206_v52 = vpop.f32.mrb[63].mxu1 }
 0x23b   : > { %1547 = vst.msk [vmem:[%s2892_s23 + $0xf8] sm:$0xff] %vm1515_vm2, %v1357_v51 }
 0x23c   : > { %v1361_v6 = vpop.f32.mrb[64].mxu1 }
 0x23d   : > { %v1362_v53 = vadd.f32 %v2883_v44, %v1361_v6  ;;  %v2209_v54 = vpop.f32.mrb[65].mxu1 }
 0x23f   : > { %1548 = vst.msk [vmem:[%s2892_s23 + $0x100] sm:$0xff] %vm1515_vm2, %v1362_v53 }
 0x240   : > { %v1366_v55 = vpop.f32.mrb[66].mxu1 }
 0x241   : > { %v1367_v56 = vadd.f32 %v2883_v44, %v1366_v55  ;;  %v2212_v57 = vpop.f32.mrb[67].mxu1 }
 0x243   : > { %1549 = vst.msk [vmem:[%s2892_s23 + $0x108] sm:$0xff] %vm1515_vm2, %v1367_v56 }
 0x244   : > { %v1371_v58 = vpop.f32.mrb[68].mxu1 }
 0x245   : > { %v1372_v59 = vadd.f32 %v2883_v44, %v1371_v58  ;;  %v2215_v60 = vpop.f32.mrb[69].mxu1 }
 0x247   : > { %1550 = vst.msk [vmem:[%s2892_s23 + $0x110] sm:$0xff] %vm1515_vm2, %v1372_v59 }
 0x248   : > { %v1376_v61 = vpop.f32.mrb[70].mxu1 }
 0x249   : > { %v1377_v62 = vadd.f32 %v2883_v44, %v1376_v61  ;;  %v2218_v63 = vpop.f32.mrb[71].mxu1 }
 0x24b   : > { %1551 = vst.msk [vmem:[%s2892_s23 + $0x118] sm:$0xff] %vm1515_vm2, %v1377_v62 }
 0x24c   : > { %v1381_v0 = vpop.f32.mrb[72].mxu1 }
 0x24d   : > { %v1382_v1 = vadd.f32 %v2883_v44, %v1381_v0  ;;  %v2221_v2 = vpop.f32.mrb[73].mxu1 }
 0x24f   : > { %1552 = vst.msk [vmem:[%s2892_s23 + $0x120] sm:$0xff] %vm1515_vm2, %v1382_v1 }
 0x250   : > { %v1386_v4 = vpop.f32.mrb[74].mxu1 }
 0x251   : > { %v1387_v5 = vadd.f32 %v2883_v44, %v1386_v4  ;;  %v2224_v7 = vpop.f32.mrb[75].mxu1 }
 0x253   : > { %1553 = vst.msk [vmem:[%s2892_s23 + $0x128] sm:$0xff] %vm1515_vm2, %v1387_v5 }
 0x254   : > { %v1391_v8 = vpop.f32.mrb[76].mxu1 }
 0x255   : > { %v1392_v9 = vadd.f32 %v2883_v44, %v1391_v8  ;;  %v2227_v10 = vpop.f32.mrb[77].mxu1 }
 0x257   : > { %1554 = vst.msk [vmem:[%s2892_s23 + $0x130] sm:$0xff] %vm1515_vm2, %v1392_v9 }
 0x258   : > { %v1396_v11 = vpop.f32.mrb[78].mxu1 }
 0x259   : > { %v1397_v12 = vadd.f32 %v2883_v44, %v1396_v11  ;;  %v2230_v13 = vpop.f32.mrb[79].mxu1 }
 0x25b   : > { %1555 = vst.msk [vmem:[%s2892_s23 + $0x138] sm:$0xff] %vm1515_vm2, %v1397_v12 }
 0x25c   : > { %v1401_v14 = vpop.f32.mrb[80].mxu1 }
 0x25d   : > { %v1402_v15 = vadd.f32 %v2883_v44, %v1401_v14  ;;  %v2233_v16 = vpop.f32.mrb[81].mxu1 }
 0x25f   : > { %1556 = vst.msk [vmem:[%s2892_s23 + $0x140] sm:$0xff] %vm1515_vm2, %v1402_v15 }
 0x260   : > { %v1406_v17 = vpop.f32.mrb[82].mxu1 }
 0x261   : > { %v1407_v18 = vadd.f32 %v2883_v44, %v1406_v17  ;;  %v2236_v19 = vpop.f32.mrb[83].mxu1 }
 0x263   : > { %1557 = vst.msk [vmem:[%s2892_s23 + $0x148] sm:$0xff] %vm1515_vm2, %v1407_v18 }
 0x264   : > { %v1411_v20 = vpop.f32.mrb[84].mxu1 }
 0x265   : > { %v1412_v21 = vadd.f32 %v2883_v44, %v1411_v20  ;;  %v2239_v22 = vpop.f32.mrb[85].mxu1 }
 0x267   : > { %1558 = vst.msk [vmem:[%s2892_s23 + $0x150] sm:$0xff] %vm1515_vm2, %v1412_v21 }
 0x268   : > { %v1416_v23 = vpop.f32.mrb[86].mxu1 }
 0x269   : > { %v1417_v24 = vadd.f32 %v2883_v44, %v1416_v23  ;;  %v2242_v25 = vpop.f32.mrb[87].mxu1 }
 0x26b   : > { %1559 = vst.msk [vmem:[%s2892_s23 + $0x158] sm:$0xff] %vm1515_vm2, %v1417_v24 }
 0x26c   : > { %v1421_v26 = vpop.f32.mrb[88].mxu1 }
 0x26d   : > { %v1422_v27 = vadd.f32 %v2883_v44, %v1421_v26  ;;  %v2245_v28 = vpop.f32.mrb[89].mxu1 }
 0x26f   : > { %1560 = vst.msk [vmem:[%s2892_s23 + $0x160] sm:$0xff] %vm1515_vm2, %v1422_v27 }
 0x270   : > { %v1426_v29 = vpop.f32.mrb[90].mxu1 }
 0x271   : > { %v1427_v30 = vadd.f32 %v2883_v44, %v1426_v29  ;;  %v2248_v31 = vpop.f32.mrb[91].mxu1 }
 0x273   : > { %1561 = vst.msk [vmem:[%s2892_s23 + $0x168] sm:$0xff] %vm1515_vm2, %v1427_v30 }
 0x274   : > { %v1431_v32 = vpop.f32.mrb[92].mxu1 }
 0x275   : > { %v1432_v33 = vadd.f32 %v2883_v44, %v1431_v32  ;;  %v2251_v34 = vpop.f32.mrb[93].mxu1 }
 0x277   : > { %1562 = vst.msk [vmem:[%s2892_s23 + $0x170] sm:$0xff] %vm1515_vm2, %v1432_v33 }
 0x278   : > { %v1436_v35 = vpop.f32.mrb[94].mxu1 }
 0x279   : > { %v1437_v36 = vadd.f32 %v2883_v44, %v1436_v35  ;;  %v2254_v37 = vpop.f32.mrb[95].mxu1 }
 0x27b   : > { %1563 = vst.msk [vmem:[%s2892_s23 + $0x178] sm:$0xff] %vm1515_vm2, %v1437_v36 }
 0x27c   : > { %v1441_v38 = vpop.f32.mrb[96].mxu1 }
 0x27d   : > { %v1442_v39 = vadd.f32 %v2883_v44, %v1441_v38  ;;  %v2257_v40 = vpop.f32.mrb[97].mxu1 }
 0x27f   : > { %1564 = vst.msk [vmem:[%s2892_s23 + $0x180] sm:$0xff] %vm1515_vm2, %v1442_v39 }
 0x280   : > { %v1446_v41 = vpop.f32.mrb[98].mxu1 }
 0x281   : > { %v1447_v42 = vadd.f32 %v2883_v44, %v1446_v41  ;;  %v2260_v43 = vpop.f32.mrb[99].mxu1 }
 0x283   : > { %1565 = vst.msk [vmem:[%s2892_s23 + $0x188] sm:$0xff] %vm1515_vm2, %v1447_v42 }
 0x284   : > { %v1451_v45 = vpop.f32.mrb[100].mxu1 }
 0x285   : > { %v1452_v46 = vadd.f32 %v2883_v44, %v1451_v45  ;;  %v2263_v47 = vpop.f32.mrb[101].mxu1 }
 0x287   : > { %1566 = vst.msk [vmem:[%s2892_s23 + $0x190] sm:$0xff] %vm1515_vm2, %v1452_v46 }
 0x288   : > { %v1456_v48 = vpop.f32.mrb[102].mxu1 }
 0x289   : > { %v1457_v49 = vadd.f32 %v2883_v44, %v1456_v48  ;;  %v2266_v50 = vpop.f32.mrb[103].mxu1 }
 0x28b   : > { %1567 = vst.msk [vmem:[%s2892_s23 + $0x198] sm:$0xff] %vm1515_vm2, %v1457_v49 }
 0x28c   : > { %v1461_v3 = vpop.f32.mrb[104].mxu1 }
 0x28d   : > { %v1462_v51 = vadd.f32 %v2883_v44, %v1461_v3  ;;  %v2269_v52 = vpop.f32.mrb[105].mxu1 }
 0x28f   : > { %1568 = vst.msk [vmem:[%s2892_s23 + $0x1a0] sm:$0xff] %vm1515_vm2, %v1462_v51 }
 0x290   : > { %v1466_v6 = vpop.f32.mrb[106].mxu1 }
 0x291   : > { %v1467_v53 = vadd.f32 %v2883_v44, %v1466_v6  ;;  %v2272_v54 = vpop.f32.mrb[107].mxu1 }
 0x293   : > { %1569 = vst.msk [vmem:[%s2892_s23 + $0x1a8] sm:$0xff] %vm1515_vm2, %v1467_v53 }
 0x294   : > { %v1471_v55 = vpop.f32.mrb[108].mxu1 }
 0x295   : > { %v1472_v56 = vadd.f32 %v2883_v44, %v1471_v55  ;;  %v2275_v57 = vpop.f32.mrb[109].mxu1 }
 0x297   : > { %1570 = vst.msk [vmem:[%s2892_s23 + $0x1b0] sm:$0xff] %vm1515_vm2, %v1472_v56 }
 0x298   : > { %v1476_v58 = vpop.f32.mrb[110].mxu1 }
 0x299   : > { %v1477_v59 = vadd.f32 %v2883_v44, %v1476_v58  ;;  %v2278_v60 = vpop.f32.mrb[111].mxu1 }
 0x29b   : > { %1571 = vst.msk [vmem:[%s2892_s23 + $0x1b8] sm:$0xff] %vm1515_vm2, %v1477_v59 }
 0x29c   : > { %v1481_v61 = vpop.f32.mrb[112].mxu1 }
 0x29d   : > { %v1482_v62 = vadd.f32 %v2883_v44, %v1481_v61  ;;  %v2281_v63 = vpop.f32.mrb[113].mxu1 }
 0x29f   : > { %1572 = vst.msk [vmem:[%s2892_s23 + $0x1c0] sm:$0xff] %vm1515_vm2, %v1482_v62 }
 0x2a0   : > { %v1486_v0 = vpop.f32.mrb[114].mxu1 }
 0x2a1   : > { %v1487_v1 = vadd.f32 %v2883_v44, %v1486_v0  ;;  %v2284_v2 = vpop.f32.mrb[115].mxu1 }
 0x2a3   : > { %1573 = vst.msk [vmem:[%s2892_s23 + $0x1c8] sm:$0xff] %vm1515_vm2, %v1487_v1 }
 0x2a4   : > { %v1491_v4 = vpop.f32.mrb[116].mxu1 }
 0x2a5   : > { %v1492_v5 = vadd.f32 %v2883_v44, %v1491_v4  ;;  %v2287_v7 = vpop.f32.mrb[117].mxu1 }
 0x2a7   : > { %1574 = vst.msk [vmem:[%s2892_s23 + $0x1d0] sm:$0xff] %vm1515_vm2, %v1492_v5 }
 0x2a8   : > { %v1496_v8 = vpop.f32.mrb[118].mxu1 }
 0x2a9   : > { %v1497_v9 = vadd.f32 %v2883_v44, %v1496_v8  ;;  %v2290_v10 = vpop.f32.mrb[119].mxu1 }
 0x2ab   : > { %1575 = vst.msk [vmem:[%s2892_s23 + $0x1d8] sm:$0xff] %vm1515_vm2, %v1497_v9 }
 0x2ac   : > { %v1501_v11 = vpop.f32.mrb[120].mxu1 }
 0x2ad   : > { %v1502_v12 = vadd.f32 %v2883_v44, %v1501_v11  ;;  %v2293_v13 = vpop.f32.mrb[121].mxu1 }
 0x2af   : > { %1576 = vst.msk [vmem:[%s2892_s23 + $0x1e0] sm:$0xff] %vm1515_vm2, %v1502_v12 }
 0x2b0   : > { %v1506_v14 = vpop.f32.mrb[122].mxu1 }
 0x2b1   : > { %v1507_v15 = vadd.f32 %v2883_v44, %v1506_v14  ;;  %v2296_v16 = vpop.f32.mrb[123].mxu1 }
 0x2b3   : > { %1577 = vst.msk [vmem:[%s2892_s23 + $0x1e8] sm:$0xff] %vm1515_vm2, %v1507_v15 }
 0x2b4   : > { %v1511_v17 = vpop.f32.mrb[124].mxu1 }
 0x2b5   : > { %v1512_v18 = vadd.f32 %v2883_v44, %v1511_v17  ;;  %v2299_v19 = vpop.f32.mrb[125].mxu1 }
 0x2b7   : > { %1578 = vst.msk [vmem:[%s2892_s23 + $0x1f0] sm:$0xff] %vm1515_vm2, %v1512_v18 }
 0x2b8 PF: > { %s15_s18 = sadd.s32 1, %s2329_s18  }
 0x2b9   : > { %p12_p4 = scmp.ge.s32.totalorder %s15_s18, 4  }
 0x2bb   :  { %14 = sbr.rel (!%p12_p4) target bundleno = 1 (0x1), region = 70 }

</bundles_post_ra>
